<compile_context>
chip_gen: v5e
topology: v5e:2x2
jax: 0.10.0
libtpu: 0.0.40
codegen_flags: <defaults>
</compile_context>

<pallas_src>
import math

import jax
import jax.numpy as jnp
from jax.experimental import pallas as pl
from jax.experimental.pallas import tpu as pltpu

ROUND_SCALE = 0.0001736
SQRT2 = math.sqrt(2.0)
PI_OVER_4 = math.pi / 4.0


def _bpe_kernel(time_ref, const_ref, pe_ref, interval_ref):
    """time_ref: (W, tb, L); const_ref: (2, W, L) = [Wt, arc]; outputs: (W, tb, L).

    const_ref[1] already contains position*div_term + pi/4, so
    sin(x) + cos(x) == sqrt(2) * sin(arc + phi).
    """
    W = time_ref.shape[0]
    tb = time_ref.shape[1]
    L = time_ref.shape[2]

    t = time_ref[...]                   # (W, tb, L)  single load
    wt = const_ref[0]                   # (W, L)
    arc = const_ref[1]                  # (W, L)

    # Rows 1..W-1: prepend-zero diff without a concat temp. Keep the divide for
    # bit-parity with torch.round(diff / 0.0001736) (EUP divide is hidden here).
    interval_tail = jnp.round((t[1:] - t[:-1]) / ROUND_SCALE)              # (W-1, tb, L)
    x_tail = arc[1:][:, None, :] + interval_tail * wt[1:][:, None, :]      # (W-1, tb, L)
    pe_ref[pl.ds(1, W - 1)] = (SQRT2 * jnp.sin(x_tail)).astype(pe_ref.dtype)
    interval_ref[pl.ds(1, W - 1)] = interval_tail.astype(interval_ref.dtype)

    # Row 0: interval == 0 and phi == 0, so pe is batch-invariant. Compute the sin
    # on a (1, L) slice only and broadcast-store it (no per-batch EUP work).
    pe0 = SQRT2 * jnp.sin(arc[0:1])                                        # (1, L)
    pe_ref[pl.ds(0, 1)] = jnp.broadcast_to(
        pe0[:, None, :], (1, tb, L)).astype(pe_ref.dtype)
    interval_ref[pl.ds(0, 1)] = jnp.zeros((1, tb, L), interval_ref.dtype)


def _vmem_budget_and_limit():
    """Generation-aware (budget_for_tiling, vmem_limit_bytes)."""
    try:
        cap = int(pltpu.get_tpu_info().vmem_capacity_bytes)
    except Exception:
        cap = 64 << 20                      # conservative: v7x per-TC size
    if cap >= (96 << 20):                   # v5e / v6e: 128 MiB physical VMEM
        return 48 << 20, 64 << 20
    # v7x: 64 MiB per TensorCore -> leave headroom for compiler internal scratch.
    return 24 << 20, 32 << 20


def _pick_tb(Bf, W, L, pe_bytes, iv_bytes, vmem_budget):
    """Batch-tile size. Counts pipeline buffers AND kernel-internal temporaries."""
    # Per unit of tb (bytes):
    #   2x double-buffered f32 input tile        : 2*4
    #   2x double-buffered pe tile               : 2*pe_bytes
    #   2x double-buffered interval tile         : 2*iv_bytes
    #   ~4 f32 kernel temporaries (t, diff, x, sin result)
    per_tb = W * L * (2 * 4 + 2 * pe_bytes + 2 * iv_bytes + 4 * 4)
    max_tb = max(1, vmem_budget // per_tb)

    if Bf <= 8:
        # Block second-to-last dim must be a multiple of 8 or the full extent; with
        # Bf <= 8 only the full extent is legal.
        return Bf

    tb = max(8, min(Bf, (max_tb // 8) * 8))

    # Megacore (v7x: 2 TensorCores sharded along the 'parallel' axis): keep >= 2
    # grid blocks when possible, >= 4 for better balance, never below 8 rows/block.
    if Bf >= 16:
        target_blocks = 4 if Bf >= 32 else 2
        tb = min(tb, max(8, ((Bf // target_blocks) // 8) * 8))
    return tb


def biased_positional_embedding(time, Wt, position, div_term,
                                pe_dtype=jnp.bfloat16,
                                interval_dtype=jnp.int32):
    """time: (W, B, D); Wt: (W, D); position: (W, 1); div_term: (D,).

    Defaults write pe as bf16 and interval as int32 straight from the kernel (values
    identical to the PyTorch module up to the output dtype). Pass
    pe_dtype=interval_dtype=jnp.float32 to reproduce the PyTorch output dtypes.
    """
    W, B, D = time.shape
    assert W >= 2, "slide_win must be >= 2"
    # arc precompute assumes the PyTorch-side invariant max_len == slide_win (== W).
    assert position.shape[0] == W, "max_len must equal slide_win for this module"

    # --- lane-dense layout: smallest fold G | B with (G*D) % 128 == 0 -> last block
    #     dim is a multiple of 128 (unmasked full-width vst). ---
    G = None
    for g in range(1, B + 1):
        if B % g == 0 and (g * D) % 128 == 0:
            G = g
            break

    D_k = D
    if G is None:
        # Fallback: pad D up to the next multiple of 128 (wrapper pads inputs, slices
        # outputs). <2x padded bandwidth beats masked vst.msk stores.
        D_k = ((D + 127) // 128) * 128
        time = jnp.pad(time, ((0, 0), (0, 0), (0, D_k - D)))
        Wt = jnp.pad(Wt, ((0, 0), (0, D_k - D)))
        div_term = jnp.pad(div_term, (0, D_k - D))
        G = 1

    L = G * D_k
    Bf = B // G

    time_f = time.reshape(W, Bf, L)

    # arc precomputed once in the wrapper; fold in +pi/4 for the sqrt(2)*sin identity.
    arc = position * div_term.reshape(1, D_k) + PI_OVER_4                  # (W, D_k)
    wt_f = jnp.tile(Wt, (1, G)) if G > 1 else Wt                           # (W, L)
    arc_f = jnp.tile(arc, (1, G)) if G > 1 else arc                        # (W, L)
    const = jnp.stack([wt_f, arc_f], axis=0).astype(jnp.float32)          # (2, W, L)

    pe_bytes = jnp.dtype(pe_dtype).itemsize
    iv_bytes = jnp.dtype(interval_dtype).itemsize
    vmem_budget, vmem_limit = _vmem_budget_and_limit()
    tb = _pick_tb(Bf, W, L, pe_bytes, iv_bytes, vmem_budget)
    nb = pl.cdiv(Bf, tb)   # last block may be partial; Pallas masks its writes

    pe_f, interval_f = pl.pallas_call(
        _bpe_kernel,
        out_shape=(
            jax.ShapeDtypeStruct((W, Bf, L), pe_dtype),
            jax.ShapeDtypeStruct((W, Bf, L), interval_dtype),
        ),
        grid_spec=pltpu.PrefetchScalarGridSpec(
            num_scalar_prefetch=0,
            grid=(nb,),
            in_specs=[
                pl.BlockSpec((W, tb, L), lambda b: (0, b, 0)),
                pl.BlockSpec((2, W, L), lambda b: (0, 0, 0)),
            ],
            out_specs=[
                pl.BlockSpec((W, tb, L), lambda b: (0, b, 0)),
                pl.BlockSpec((W, tb, L), lambda b: (0, b, 0)),
            ],
        ),
        compiler_params=pltpu.CompilerParams(
            dimension_semantics=("parallel",),
            vmem_limit_bytes=vmem_limit,
        ),
    )(time_f, const)

    pe = pe_f.reshape(W, B, D_k)
    interval = interval_f.reshape(W, B, D_k)
    if D_k != D:
        pe = pe[..., :D]
        interval = interval[..., :D]
    return pe, interval


def reference(time, Wt, position, div_term):
    diff = jnp.diff(time, axis=0)
    pad = jnp.zeros((1, time.shape[1], time.shape[2]), jnp.float32)
    diff = jnp.concatenate([pad, diff], axis=0)
    interval = jnp.round(diff / ROUND_SCALE)
    phi = jnp.einsum('wbi,wi->wbi', interval, Wt)
    arc = (position * div_term)[:, None, :]
    pe = jnp.sin(arc + phi) + jnp.cos(arc + phi)
    return pe, interval


if __name__ == "__main__":
    # Small shapes: slide_win (W) = 8, batch = 4, d_model = 32, max_len = slide_win.
    d_model = 32
    slide_win = 8
    max_len = slide_win  # PyTorch forward only broadcasts when max_len == W
    batch = 4

    key = jax.random.PRNGKey(0)
    k_time, k_wt = jax.random.split(key)

    # Buffers (deterministic, same formulas as __init__)
    position = jnp.arange(0, max_len, dtype=jnp.float32)[:, None]            # (W, 1)
    div_term = jnp.exp(
        jnp.arange(0, d_model, dtype=jnp.float32) * (-math.log(10000.0) / d_model)
    )                                                                          # (D,)
    Wt = jax.random.normal(k_wt, (slide_win, d_model), dtype=jnp.float32) * 0.02

    # Monotone-ish timestamps so diffs are meaningful
    time = jnp.cumsum(
        jnp.abs(jax.random.normal(k_time, (slide_win, batch, d_model), dtype=jnp.float32))
        * 0.001,
        axis=0,
    )

    pe_ref_v, interval_ref_v = reference(time, Wt, position, div_term)

    # 1) Default (narrow-output) path: pe bf16, interval int32 written in-kernel.
    pe, interval = biased_positional_embedding(time, Wt, position, div_term)
    pe = jax.block_until_ready(pe)
    interval = jax.block_until_ready(interval)
    assert pe.dtype == jnp.bfloat16 and interval.dtype == jnp.int32
    assert jnp.allclose(pe.astype(jnp.float32), pe_ref_v, atol=1.5e-2, rtol=1.5e-2), \
        "pe (bf16) mismatch"
    assert jnp.allclose(interval.astype(jnp.float32), interval_ref_v,
                        atol=1e-5, rtol=1e-5), "interval (int32) mismatch"

    # 2) Full-precision path matches the PyTorch module's output dtypes.
    pe32, iv32 = biased_positional_embedding(
        time, Wt, position, div_term,
        pe_dtype=jnp.float32, interval_dtype=jnp.float32)
    pe32 = jax.block_until_ready(pe32)
    assert jnp.allclose(pe32, pe_ref_v, atol=1e-5, rtol=1e-5), "pe (f32) mismatch"
    assert jnp.allclose(iv32, interval_ref_v, atol=1e-5, rtol=1e-5), "interval (f32) mismatch"

    # 3) Lane-pad fallback path (D has no 128-friendly fold): D = 24.
    d2 = 24
    div_term2 = jnp.exp(
        jnp.arange(0, d2, dtype=jnp.float32) * (-math.log(10000.0) / d2))
    Wt2 = jax.random.normal(k_wt, (slide_win, d2), dtype=jnp.float32) * 0.02
    time2 = time[..., :d2]
    pe2, iv2 = biased_positional_embedding(
        time2, Wt2, position, div_term2,
        pe_dtype=jnp.float32, interval_dtype=jnp.float32)
    pe2 = jax.block_until_ready(pe2)
    pe2_ref, iv2_ref = reference(time2, Wt2, position, div_term2)
    assert jnp.allclose(pe2, pe2_ref, atol=1e-5, rtol=1e-5), "padded-D pe mismatch"
    assert jnp.allclose(iv2, iv2_ref, atol=1e-5, rtol=1e-5), "padded-D interval mismatch"

    print("KERNEL_OK")
</pallas_src>

<mosaic_0001>
module attributes {stable_mosaic.version = 11 : i64} {
  func.func @_bpe_kernel(%arg0: i32, %arg1: memref<8x1x128xf32, #tpu.memory_space<vmem>>, %arg2: memref<2x8x128xf32, #tpu.memory_space<vmem>>, %arg3: memref<8x1x128xbf16, #tpu.memory_space<vmem>>, %arg4: memref<8x1x128xi32, #tpu.memory_space<vmem>>) attributes {dimension_semantics = [#tpu.dimension_semantics<parallel>], iteration_bounds = array<i64: 1>, scalar_prefetch = 0 : i64, scratch_operands = 0 : i64, tpu.core_type = #tpu.core_type<tc>, window_params = [{transform_indices = @transform_0, window_bounds = array<i64: 8, 1, 128>}, {pipeline_mode = #tpu.pipeline_mode<synchronous>, transform_indices = @transform_1, window_bounds = array<i64: 2, 8, 128>}, {transform_indices = @transform_2, window_bounds = array<i64: 8, 1, 128>}, {transform_indices = @transform_3, window_bounds = array<i64: 8, 1, 128>}]} {
    %c0 = arith.constant 0 : index
    %c0_0 = arith.constant 0 : index
    %c0_1 = arith.constant 0 : index
    %0 = vector.load %arg1[%c0, %c0_0, %c0_1] : memref<8x1x128xf32, #tpu.memory_space<vmem>>, vector<8x1x128xf32>
    %c0_2 = arith.constant 0 : index
    %c0_3 = arith.constant 0 : index
    %c0_4 = arith.constant 0 : index
    %1 = vector.load %arg2[%c0_2, %c0_3, %c0_4] : memref<2x8x128xf32, #tpu.memory_space<vmem>>, vector<1x8x128xf32>
    %2 = vector.shape_cast %1 : vector<1x8x128xf32> to vector<8x128xf32>
    %c1 = arith.constant 1 : index
    %c0_5 = arith.constant 0 : index
    %c0_6 = arith.constant 0 : index
    %3 = vector.load %arg2[%c1, %c0_5, %c0_6] : memref<2x8x128xf32, #tpu.memory_space<vmem>>, vector<1x8x128xf32>
    %4 = vector.shape_cast %3 : vector<1x8x128xf32> to vector<8x128xf32>
    %5 = vector.extract_strided_slice %0 {offsets = [1, 0, 0], sizes = [7, 1, 128], strides = [1, 1, 1]} : vector<8x1x128xf32> to vector<7x1x128xf32>
    %6 = vector.extract_strided_slice %0 {offsets = [0, 0, 0], sizes = [7, 1, 128], strides = [1, 1, 1]} : vector<8x1x128xf32> to vector<7x1x128xf32>
    %7 = arith.subf %5, %6 : vector<7x1x128xf32>
    %cst = arith.constant 1.736000e-04 : f32
    %8 = vector.broadcast %cst : f32 to vector<7x1x128xf32>
    %9 = arith.divf %7, %8 : vector<7x1x128xf32>
    %10 = math.roundeven %9 : vector<7x1x128xf32>
    %11 = vector.extract_strided_slice %4 {offsets = [1, 0], sizes = [7, 128], strides = [1, 1]} : vector<8x128xf32> to vector<7x128xf32>
    %12 = vector.shape_cast %11 : vector<7x128xf32> to vector<7x1x128xf32>
    %13 = vector.extract_strided_slice %2 {offsets = [1, 0], sizes = [7, 128], strides = [1, 1]} : vector<8x128xf32> to vector<7x128xf32>
    %14 = vector.shape_cast %13 : vector<7x128xf32> to vector<7x1x128xf32>
    %15 = arith.mulf %10, %14 : vector<7x1x128xf32>
    %16 = arith.addf %12, %15 : vector<7x1x128xf32>
    %17 = math.sin %16 : vector<7x1x128xf32>
    %cst_7 = arith.constant 1.41421354 : f32
    %18 = vector.broadcast %cst_7 : f32 to vector<7x1x128xf32>
    %19 = arith.mulf %18, %17 : vector<7x1x128xf32>
    %20 = arith.truncf %19 : vector<7x1x128xf32> to vector<7x1x128xbf16>
    %c1_8 = arith.constant 1 : index
    %c0_9 = arith.constant 0 : index
    %c0_10 = arith.constant 0 : index
    %21 = vector.load %arg3[%c1_8, %c0_9, %c0_10] : memref<8x1x128xbf16, #tpu.memory_space<vmem>>, vector<7x1x128xbf16>
    tpu.vector_store %arg3[%c1_8, %c0_9, %c0_10], %20 {strides = array<i32>} : memref<8x1x128xbf16, #tpu.memory_space<vmem>>, vector<7x1x128xbf16>,
    %22 = arith.fptosi %10 : vector<7x1x128xf32> to vector<7x1x128xi32>
    %c1_11 = arith.constant 1 : index
    %c0_12 = arith.constant 0 : index
    %c0_13 = arith.constant 0 : index
    %23 = vector.load %arg4[%c1_11, %c0_12, %c0_13] : memref<8x1x128xi32, #tpu.memory_space<vmem>>, vector<7x1x128xi32>
    tpu.vector_store %arg4[%c1_11, %c0_12, %c0_13], %22 {strides = array<i32>} : memref<8x1x128xi32, #tpu.memory_space<vmem>>, vector<7x1x128xi32>,
    %24 = vector.extract_strided_slice %4 {offsets = [0, 0], sizes = [1, 128], strides = [1, 1]} : vector<8x128xf32> to vector<1x128xf32>
    %25 = math.sin %24 : vector<1x128xf32>
    %cst_14 = arith.constant 1.41421354 : f32
    %26 = vector.broadcast %cst_14 : f32 to vector<1x128xf32>
    %27 = arith.mulf %26, %25 : vector<1x128xf32>
    %28 = vector.shape_cast %27 : vector<1x128xf32> to vector<1x1x128xf32>
    %29 = arith.truncf %28 : vector<1x1x128xf32> to vector<1x1x128xbf16>
    %c0_15 = arith.constant 0 : index
    %c0_16 = arith.constant 0 : index
    %c0_17 = arith.constant 0 : index
    %30 = vector.load %arg3[%c0_15, %c0_16, %c0_17] : memref<8x1x128xbf16, #tpu.memory_space<vmem>>, vector<1x1x128xbf16>
    tpu.vector_store %arg3[%c0_15, %c0_16, %c0_17], %29 {strides = array<i32>} : memref<8x1x128xbf16, #tpu.memory_space<vmem>>, vector<1x1x128xbf16>,
    %c0_i32 = arith.constant 0 : i32
    %31 = vector.broadcast %c0_i32 : i32 to vector<1x1x128xi32>
    %c0_18 = arith.constant 0 : index
    %c0_19 = arith.constant 0 : index
    %c0_20 = arith.constant 0 : index
    %32 = vector.load %arg4[%c0_18, %c0_19, %c0_20] : memref<8x1x128xi32, #tpu.memory_space<vmem>>, vector<1x1x128xi32>
    tpu.vector_store %arg4[%c0_18, %c0_19, %c0_20], %31 {strides = array<i32>} : memref<8x1x128xi32, #tpu.memory_space<vmem>>, vector<1x1x128xi32>,
    return
  }
  func.func @transform_0(%arg0: i32) -> (i32, i32, i32) {
    %c0_i32 = arith.constant 0 : i32
    %c0_i32_0 = arith.constant 0 : i32
    %c0_i32_1 = arith.constant 0 : i32
    return %c0_i32, %arg0, %c0_i32_0 : i32, i32, i32
  }
  func.func @transform_1(%arg0: i32) -> (i32, i32, i32) {
    %c0_i32 = arith.constant 0 : i32
    %c0_i32_0 = arith.constant 0 : i32
    %c0_i32_1 = arith.constant 0 : i32
    %c0_i32_2 = arith.constant 0 : i32
    return %c0_i32, %c0_i32_0, %c0_i32_1 : i32, i32, i32
  }
  func.func @transform_2(%arg0: i32) -> (i32, i32, i32) {
    %c0_i32 = arith.constant 0 : i32
    %c0_i32_0 = arith.constant 0 : i32
    %c0_i32_1 = arith.constant 0 : i32
    return %c0_i32, %arg0, %c0_i32_0 : i32, i32, i32
  }
  func.func @transform_3(%arg0: i32) -> (i32, i32, i32) {
    %c0_i32 = arith.constant 0 : i32
    %c0_i32_0 = arith.constant 0 : i32
    %c0_i32_1 = arith.constant 0 : i32
    return %c0_i32, %arg0, %c0_i32_0 : i32, i32, i32
  }
}

</mosaic_0001>

<bundles_post_ra>
// kernel: tpu_custom_call.1
= control target key start
LH: loop header
LB: loop body
LE: loop exit
PB: predicated region body
PF: predicated region fallthrough
CT: control target
= control target key end

     0   :  { %9 = vsyncpa [#allocation3], 0  ;;  %s2941_s0 = inlined_call_operand.hbm [shape: f32[8,1,128], index: 0, kind: input, shape index: {}]   ;;  %s2942_s1 = inlined_call_operand.hbm [shape: f32[2,8,128], index: 1, kind: input, shape index: {}]   ;;  %s2943_s2 = inlined_call_operand.vmem [shape: bf16[8,1,128], index: 2, kind: output, shape index: {0}]   ;;  %s2944_s3 = inlined_call_operand.hbm [shape: s32[8,1,128], index: 3, kind: output, shape index: {1}]  }
   0x1   :  { %10 = vsyncpa [#allocation6], 0 }
   0x2   :  { %11 = vsyncpa [#allocation4], 0  ;;  %s16_s14 = sshll.u32 %s2941_s0, 4  ;;  %s1679_s15 = smov [#allocation2]   ;;  %s17_s14 = int_to_ptr.hbm [resolvable:$true] %s16_s14 }
   0x3   :  { %s18_s16 = sshll.u32 %s1679_s15, 4  ;;  %s29_s19 = sshll.u32 %s2942_s1, 4  ;;  %s19_s16 = int_to_ptr.vmem [resolvable:$true] %s18_s16  ;;  %s30_s19 = int_to_ptr.hbm [resolvable:$true] %s29_s19 }
   0x4   :  { %s1680_s20 = smov 16   ;;  %s1681_s21 = smov 1  }
   0x5   :  { %24 = dma.hbm_to_vmem [thread:$0]  %s17_s14, 128, %s19_s16, [#allocation3], %s1680_s20, %s1680_s20, %s1681_s21  }
   0x6   :  { %s1682_s22 = smov [#allocation5]   ;;  %s1683_s24 = smov 128  }
   0x7   :  { %s31_s23 = sshll.u32 %s1682_s22, 4  ;;  %s1684_s0 = smov 8   ;;  %s32_s23 = int_to_ptr.vmem [resolvable:$true] %s31_s23 }
   0x8   :  { %37 = dma.hbm_to_vmem [thread:$0]  %s30_s19, 256, %s32_s23, [#allocation6], %s1683_s24, %s1683_s24, %s1684_s0  }
   0x9   :  { %1673 = dma.done.wait [#allocation3], 128  }
   0xa   :  { %1674 = vsyncadd [#allocation3], 4294967168 }
   0xb   :  { %1675 = dma.done.wait [#allocation6], 256  }
   0xc   :  { %1676 = vsyncadd [#allocation6], 4294967040  ;;  %v1685_v0 = vmov 0.0001736   ;;  %v46_v2 = vld [vmem:[#allocation2] sm:$0x1] }
   0xd   :  { %1599 = vrcp.f32 %v1685_v0  ;;  %v1723_v3 = vld [vmem:[#allocation5 + $0x8] sm:$0xff]  ;;  %v47_v5 = vld [vmem:[#allocation2 + $0x1] sm:$0x1]  ;;  %v48_v6 = vld [vmem:[#allocation2 + $0x2] sm:$0x1]  ;;  %v1686_v9 = vmov 0  }
   0xe   :  { %86 = vst [vmem:[#allocation1] sm:$0xff] %v1723_v3  ;;  %v49_v7 = vld [vmem:[#allocation2 + $0x3] sm:$0x1]  ;;  %v50_v10 = vld [vmem:[#allocation2 + $0x4] sm:$0x1]  ;;  %v57_v15 = vsub.f32 %v47_v5, %v46_v2  ;;  %v58_v16 = vsub.f32 %v48_v6, %v47_v5  ;;  %v54_v21 = vld [vmem:[#allocation5] sm:$0xff] }
   0xf   :  { %1444 = vst [vmem:[#allocation7] sm:$0x1] %v1686_v9  ;;  %v51_v11 = vld [vmem:[#allocation2 + $0x5] sm:$0x1]  ;;  %v52_v12 = vld [vmem:[#allocation2 + $0x6] sm:$0x1]  ;;  %v59_v17 = vsub.f32 %v49_v7, %v48_v6  ;;  %v60_v18 = vsub.f32 %v50_v10, %v49_v7 }
  0x10   :  { %v53_v14 = vld [vmem:[#allocation2 + $0x7] sm:$0x1]  ;;  %v61_v19 = vsub.f32 %v51_v11, %v50_v10  ;;  %v62_v22 = vsub.f32 %v52_v12, %v51_v11  ;;  %s1687_s1 = smov [#allocation7]   ;;  %s1453_s28 = sshll.u32 %s2944_s3, 4  ;;  %s1454_s28 = int_to_ptr.hbm [resolvable:$true] %s1453_s28 }
  0x11   :  { %v63_v23 = vsub.f32 %v53_v14, %v52_v12  ;;  %s1783_s25 = sshll.u32 %s1687_s1, 4  ;;  %s1452_s25 = int_to_ptr.vmem [resolvable:$true] %s1783_s25 }
  0x13   :  { %v1600_v1 = vpop.eup %1599 }
  0x14   :  { %v65_v4 = vmul.f32 0.0001736, %v1600_v1  ;;  %vm69_vm0 = vweird.f32 %v1600_v1 }
  0x15   :  { %v1727_v25 = vld [vmem:[#allocation1 + $0x1] ss:$9 sm:$0xff]  ;;  %v1731_v27 = vld [vmem:[#allocation1 + $0x3] ss:$9 sm:$0xff] }
  0x16   :  { %v66_v8 = vsub.f32 1.0, %v65_v4  ;;  %v1729_v26 = vld [vmem:[#allocation1 + $0x2] ss:$9 sm:$0xff]  ;;  %v1739_v31 = vld [vmem:[#allocation1 + $0x4] ss:$9 sm:$0xff] }
  0x17   :  { %v1741_v32 = vld [vmem:[#allocation1 + $0x5] ss:$9 sm:$0xff]  ;;  %v1749_v36 = vld [vmem:[#allocation1 + $0x7] ss:$9 sm:$0xff] }
  0x18   :  { %v67_v13 = vmul.f32 %v1600_v1, %v66_v8  ;;  %v1743_v33 = vld [vmem:[#allocation1 + $0x6] ss:$9 sm:$0xff] }
  0x19   :  { %109 = vst [vmem:[#allocation1] sm:$0xff] %v54_v21 }
  0x1a   :  { %v68_v20 = vadd.f32 %v1600_v1, %v67_v13 }
  0x1c   :  { %v70_v24 = vsel %vm69_vm0, %v1600_v1, %v68_v20 }
  0x1d   :  { %v1733_v28 = vmul.f32 %v70_v24, %v57_v15  ;;  %v1735_v29 = vmul.f32 %v70_v24, %v58_v16  ;;  %v1737_v30 = vmul.f32 %v70_v24, %v59_v17  ;;  %v1745_v34 = vmul.f32 %v70_v24, %v60_v18 }
  0x1e   :  { %v1747_v35 = vmul.f32 %v70_v24, %v61_v19  ;;  %v1751_v37 = vmul.f32 %v70_v24, %v62_v22  ;;  %v1756_v41 = vmul.f32 %v70_v24, %v63_v23 }
  0x1f   :  { %v1507_v38 = vand.u32 2147483647, %v1733_v28  ;;  %v1509_v39 = vcvt.f32.s32 %v1733_v28  ;;  %v1515_v40 = vand.u32 2147483647, %v1735_v29  ;;  %v1517_v42 = vcvt.f32.s32 %v1735_v29 }
  0x20   :  { %v1523_v43 = vand.u32 2147483647, %v1737_v30  ;;  %v1525_v44 = vcvt.f32.s32 %v1737_v30  ;;  %v1512_v47 = vand.u32 2147483648, %v1733_v28  ;;  %v1520_v48 = vand.u32 2147483648, %v1735_v29  ;;  %v111_v19 = vld [vmem:[#allocation1 + $0x1] ss:$9 sm:$0xff] }
  0x21   :  { %vm1761_vm1 = vcmp.lt.f32.partialorder %v1507_v38, 8388608.0  ;;  %v1510_v46 = vcvt.s32.f32 %v1509_v39  ;;  %1277 = vst [vmem:[#allocation7 + $0x1] sm:$0x1] %v1509_v39  ;;  %vm1767_vm2 = vcmp.lt.f32.partialorder %v1515_v40, 8388608.0  ;;  %v1518_v50 = vcvt.s32.f32 %v1517_v42  ;;  %v113_v23 = vld [vmem:[#allocation1 + $0x2] ss:$9 sm:$0xff] }
  0x22   :  { %v1526_v51 = vcvt.s32.f32 %v1525_v44  ;;  %v1528_v52 = vand.u32 2147483648, %v1737_v30  ;;  %1278 = vst [vmem:[#allocation7 + $0x2] sm:$0x1] %v1517_v42  ;;  %vm1772_vm3 = vcmp.lt.f32.partialorder %v1523_v43, 8388608.0  ;;  %v1531_v55 = vand.u32 2147483647, %v1745_v34 }
  0x23   :  { %v1511_v53 = vand.u32 2147483647, %v1510_v46  ;;  %v1533_v56 = vcvt.f32.s32 %v1745_v34  ;;  %v1519_v57 = vand.u32 2147483647, %v1518_v50  ;;  %v1539_v59 = vand.u32 2147483647, %v1747_v35 }
  0x24   :  { %v1527_v58 = vand.u32 2147483647, %v1526_v51  ;;  %v1541_v60 = vcvt.f32.s32 %v1747_v35  ;;  %v1536_v63 = vand.u32 2147483648, %v1745_v34  ;;  %v1544_v0 = vand.u32 2147483648, %v1747_v35  ;;  %1279 = vst [vmem:[#allocation7 + $0x3] sm:$0x1] %v1525_v44 }
  0x25   :  { %v1513_v61 = vor.u32 %v1512_v47, %v1511_v53  ;;  %v1534_v62 = vcvt.s32.f32 %v1533_v56  ;;  %v1521_v1 = vor.u32 %v1520_v48, %v1519_v57  ;;  %v1547_v5 = vand.u32 2147483647, %v1751_v37  ;;  %1280 = vst [vmem:[#allocation7 + $0x4] sm:$0x1] %v1533_v56  ;;  %v115_v39 = vld [vmem:[#allocation1 + $0x3] ss:$9 sm:$0xff] }
  0x26   :  { %v1529_v2 = vor.u32 %v1528_v52, %v1527_v58  ;;  %v1542_v4 = vcvt.s32.f32 %v1541_v60  ;;  %vm1791_vm4 = vcmp.lt.f32.partialorder %v1531_v55, 8388608.0  ;;  %v1549_v10 = vcvt.f32.s32 %v1751_v37  ;;  %1281 = vst [vmem:[#allocation7 + $0x5] sm:$0x1] %v1541_v60  ;;  %v117_v40 = vld [vmem:[#allocation1 + $0x4] ss:$9 sm:$0xff] }
  0x27   :  { %v1514_v6 = vsel %vm1761_vm1, %v1513_v61, %v1733_v28  ;;  %v1535_v8 = vand.u32 2147483647, %v1534_v62  ;;  %v1522_v11 = vsel %vm1767_vm2, %v1521_v1, %v1735_v29  ;;  %vm1802_vm5 = vcmp.lt.f32.partialorder %v1539_v59, 8388608.0  ;;  %v119_v44 = vld [vmem:[#allocation1 + $0x5] ss:$9 sm:$0xff] }
  0x28   :  { %v1530_v12 = vsel %vm1772_vm3, %v1529_v2, %v1737_v30  ;;  %v1543_v14 = vand.u32 2147483647, %v1542_v4  ;;  %v1550_v16 = vcvt.s32.f32 %v1549_v10  ;;  %v1552_v17 = vand.u32 2147483648, %v1751_v37  ;;  %1282 = vst [vmem:[#allocation7 + $0x6] sm:$0x1] %v1549_v10 }
  0x29   :  { %v1537_v15 = vor.u32 %v1536_v63, %v1535_v8  ;;  %v1557_v18 = vcvt.f32.s32 %v1756_v41  ;;  %vm1809_vm6 = vcmp.lt.f32.partialorder %v1547_v5, 8388608.0  ;;  %v1555_v22 = vand.u32 2147483647, %v1756_v41  ;;  %v121_v45 = vld [vmem:[#allocation1 + $0x6] ss:$9 sm:$0xff] }
  0x2a   :  { %v1545_v20 = vor.u32 %v1544_v0, %v1543_v14  ;;  %v1551_v28 = vand.u32 2147483647, %v1550_v16  ;;  %v1560_v30 = vand.u32 2147483648, %v1756_v41  ;;  %v132_v46 = vmul.f32 %v1522_v11, %v113_v23  ;;  %v123_v49 = vld [vmem:[#allocation1 + $0x7] ss:$9 sm:$0xff] }
  0x2b   :  { %v1538_v24 = vsel %vm1791_vm4, %v1537_v15, %v1745_v34  ;;  %v1558_v29 = vcvt.s32.f32 %v1557_v18  ;;  %1283 = vst [vmem:[#allocation7 + $0x7] sm:$0x1] %v1557_v18  ;;  %v131_v34 = vmul.f32 %v1514_v6, %v111_v19  ;;  %vm1556_vm7 = vcmp.lt.f32.partialorder %v1555_v22, 8388608.0 }
  0x2c   :  { %v1546_v38 = vsel %vm1802_vm5, %v1545_v20, %v1747_v35  ;;  %1459 = dma.vmem_to_hbm [thread:$0]  %s1452_s25, 128, %s1454_s28, [#allocation4], %s1680_s20, %s1680_s20, %s1681_s21   ;;  %v1553_v42 = vor.u32 %v1552_v17, %v1551_v28  ;;  %v133_v35 = vmul.f32 %v1530_v12, %v115_v39  ;;  %v134_v50 = vmul.f32 %v1538_v24, %v117_v40 }
  0x2d   :  { %v1559_v43 = vand.u32 2147483647, %v1558_v29  ;;  %v135_v51 = vmul.f32 %v1546_v38, %v119_v44  ;;  %v1828_v53 = vadd.f32 %v131_v34, %v1727_v25  ;;  %v1832_v55 = vadd.f32 %v132_v46, %v1729_v26 }
  0x2e   :  { %v1554_v47 = vsel %vm1809_vm6, %v1553_v42, %v1751_v37  ;;  %v1835_v56 = vadd.f32 %v133_v35, %v1731_v27  ;;  %v1838_v37 = vadd.f32 %v134_v50, %v1739_v31  ;;  %v1688_v15 = vmov 683565275  }
  0x2f   :  { %v1561_v48 = vor.u32 %v1560_v30, %v1559_v43  ;;  %v136_v52 = vmul.f32 %v1554_v47, %v121_v45  ;;  %v1841_v58 = vadd.f32 %v135_v51, %v1741_v32  ;;  %v145_v25 = vand.u32 2147483647, %v1828_v53 }
  0x30   :  { %v300_v31 = vand.u32 2147483647, %v1832_v55  ;;  %v303_v61 = vand.u32 2139095040, %v1832_v55  ;;  %v458_v4 = vand.u32 2139095040, %v1835_v56  ;;  %v1689_v17 = vmov 2475754826  }
  0x31   :  { %v1562_v54 = vsel %vm1556_vm7, %v1561_v48, %v1756_v41  ;;  %v1844_v59 = vadd.f32 %v136_v52, %v1743_v33  ;;  %v148_v41 = vand.u32 2139095040, %v1828_v53  ;;  %v152_v27 = vand.u32 8388607, %v145_v25 }
  0x32   :  { %v137_v57 = vmul.f32 %v1562_v54, %v123_v49  ;;  %v304_v63 = vshrl.u32 %v303_v61, 23  ;;  %v307_v33 = vand.u32 8388607, %v300_v31  ;;  %v459_v13 = vshrl.u32 %v458_v4, 23 }
  0x33   :  { %v149_v60 = vshrl.u32 %v148_v41, 23  ;;  %v153_v62 = vor.u32 8388608, %v152_v27  ;;  %v1690_v20 = vmov 2131351028   ;;  %v1691_v23 = vmov 2102212464  }
  0x34   :  { %v1849_v26 = vadd.f32 %v137_v57, %v1749_v36  ;;  %v1472_v2 = vadd.s32 4294967169, %v304_v63  ;;  %v308_v36 = vor.u32 8388608, %v307_v33  ;;  %v2950_v29 = vmov 920167782  }
  0x35   :  { %v1469_v32 = vadd.s32 4294967169, %v149_v60  ;;  %v1857_v1 = vshll.u32 %v153_v62, 8  ;;  %v2948_v39 = vmov 1326507024   ;;  %v1889_v35 = vadd.s32 4294967169, %v459_v13 }
  0x36   :  { %v310_v6 = vadd.s32 1, %v1472_v2  ;;  %v1866_v12 = vshll.u32 %v308_v36, 8 }
  0x37   :  { %v155_v0 = vadd.s32 1, %v1469_v32  ;;  %v1861_v8 = vand.u32 65535, %v1857_v1  ;;  %v1864_v11 = vshrl.u32 %v1857_v1, 16 }
  0x38   :  { %vm311_vm9 = vcmp.gt.s32.totalorder %v310_v6, 0 }
  0x39   :  { %vm156_vm8 = vcmp.gt.s32.totalorder %v155_v0, 0  ;;  %v312_v45 = vsel %vm311_vm9, %v310_v6, 0 }
  0x3a   :  { %v157_v5 = vsel %vm156_vm8, %v155_v0, 0  ;;  %v1882_v47 = vand.u32 31, %v312_v45  ;;  %v1905_v32 = vshrl.u32 %v312_v45, 5 }
  0x3b   :  { %v159_v7 = vand.u32 31, %v157_v5  ;;  %v1868_v14 = vshrl.u32 %v157_v5, 5 }
  0x3c   :  { %v1893_v52 = vsub.s32 32, %v1882_v47  ;;  %v317_v4 = vshll.u32 %v1688_v15, %v1882_v47  ;;  %vm332_vm2 = vcmp.lt.s32.totalorder %v1905_v32, 1  ;;  %vm335_vm3 = vcmp.lt.s32.totalorder %v1905_v32, 4 }
  0x3d   :  { %v160_v10 = vsub.s32 32, %v159_v7  ;;  %v162_v16 = vshll.u32 %v1688_v15, %v159_v7  ;;  %v165_v18 = vshll.u32 %v1689_v17, %v159_v7  ;;  %v168_v22 = vshll.u32 %v1690_v20, %v159_v7 }
  0x3e   :  { %v171_v28 = vshll.u32 %v1691_v23, %v159_v7  ;;  %v174_v38 = vshll.u32 %v2950_v29, %v159_v7  ;;  %vm177_vm10 = vcmp.lt.s32.totalorder %v1868_v14, 1  ;;  %vm180_vm11 = vcmp.lt.s32.totalorder %v1868_v14, 4 }
  0x3f   :  { %v163_v19 = vshrl.u32 %v1689_v17, %v160_v10  ;;  %v166_v21 = vshrl.u32 %v1690_v20, %v160_v10  ;;  %v169_v24 = vshrl.u32 %v1691_v23, %v160_v10  ;;  %v172_v30 = vshrl.u32 %v2950_v29, %v160_v10 }
  0x40   :  { %v175_v40 = vshrl.u32 %v2948_v39, %v160_v10  ;;  %vm179_vm12 = vcmp.lt.s32.totalorder %v1868_v14, 3  ;;  %vm178_vm13 = vcmp.lt.s32.totalorder %v1868_v14, 2  ;;  %v161_v60 = vshrl.u32 %v1688_v15, %v160_v10 }
  0x41   :  { %v164_v42 = vor.u32 %v163_v19, %v162_v16  ;;  %v167_v43 = vor.u32 %v166_v21, %v165_v18  ;;  %v170_v44 = vor.u32 %v169_v24, %v168_v22  ;;  %v173_v34 = vor.u32 %v172_v30, %v171_v28 }
  0x42   :  { %v176_v46 = vor.u32 %v175_v40, %v174_v38  ;;  %v318_v5 = vshrl.u32 %v1689_v17, %v1893_v52  ;;  %v320_v10 = vshll.u32 %v1689_v17, %v1882_v47  ;;  %v321_v13 = vshrl.u32 %v1690_v20, %v1893_v52 }
  0x43   :  { %v185_v48 = vsel %vm177_vm10, %v164_v42, %v167_v43  ;;  %v189_v49 = vsel %vm177_vm10, %v167_v43, %v170_v44  ;;  %v186_v50 = vsel %vm180_vm11, %v173_v34, 920167782  ;;  %v182_v54 = vsel %vm180_vm11, %v170_v44, 2102212464 }
  0x44   :  { %v190_v51 = vsel %vm180_vm11, %v176_v46, 1326507024  ;;  %v187_v57 = vsel %vm179_vm12, %v170_v44, %v186_v50  ;;  %v181_v2 = vsel %vm177_vm10, %v161_v60, %v164_v42  ;;  %v183_v36 = vsel %vm179_vm12, %v167_v43, %v182_v54 }
  0x45   :  { %v191_v41 = vsel %vm179_vm12, %v173_v34, %v190_v51  ;;  %v188_v27 = vsel %vm178_vm13, %v185_v48, %v187_v57  ;;  %v323_v21 = vshll.u32 %v1690_v20, %v1882_v47  ;;  %v1936_v57 = vor.u32 %v321_v13, %v320_v10 }
  0x46   :  { %v192_v61 = vsel %vm178_vm13, %v189_v49, %v191_v41  ;;  %v218_v33 = vand.u32 65535, %v188_v27  ;;  %v219_v0 = vshrl.u32 %v188_v27, 16  ;;  %v324_v49 = vshrl.u32 %v1691_v23, %v1893_v52 }
  0x47   :  { %v196_v62 = vand.u32 65535, %v192_v61  ;;  %v197_v63 = vshrl.u32 %v192_v61, 16  ;;  %v326_v27 = vshll.u32 %v1691_v23, %v1882_v47  ;;  %v327_v61 = vshrl.u32 %v2950_v29, %v1893_v52 }
  0x48   :  { %v221_v18 = vmul.u32 %v219_v0, %v1861_v8  ;;  %v222_v19 = vmul.u32 %v218_v33, %v1864_v11  ;;  %v220_v28 = vmul.u32 %v218_v33, %v1861_v8  ;;  %v223_v30 = vmul.u32 %v219_v0, %v1864_v11 }
  0x49   :  { %v199_v6 = vmul.u32 %v197_v63, %v1861_v8  ;;  %v200_v7 = vmul.u32 %v196_v62, %v1864_v11  ;;  %v198_v16 = vmul.u32 %v196_v62, %v1861_v8  ;;  %v201_v22 = vmul.u32 %v197_v63, %v1864_v11 }
  0x4a   :  { %v224_v43 = vshll.u32 %v221_v18, 16  ;;  %v225_v45 = vshrl.u32 %v221_v18, 16  ;;  %v226_v34 = vshll.u32 %v222_v19, 16  ;;  %v1933_v11 = vor.u32 %v318_v5, %v317_v4 }
  0x4b   :  { %v202_v24 = vshll.u32 %v199_v6, 16  ;;  %v203_v38 = vshrl.u32 %v199_v6, 16  ;;  %v204_v40 = vshll.u32 %v200_v7, 16  ;;  %v205_v42 = vshrl.u32 %v200_v7, 16 }
  0x4c   :  { %vm228_vm15 = vc.u32 %v220_v28, %v224_v43  ;;  %v230_v48 = vadd.s32 %v224_v43, %v220_v28  ;;  %v325_v63 = vor.u32 %v324_v49, %v323_v21  ;;  %v329_v33 = vshll.u32 %v2950_v29, %v1882_v47 }
  0x4d   :  { %vm206_vm14 = vc.u32 %v198_v16, %v202_v24  ;;  %v208_v44 = vadd.s32 %v202_v24, %v198_v16  ;;  %v229_v8 = vsel %vm228_vm15, 1, %v1686_v9  ;;  %v330_v0 = vshrl.u32 %v2948_v39, %v1893_v52 }
  0x4e   :  { %v207_v46 = vsel %vm206_vm14, 1, %v1686_v9  ;;  %v231_v54 = vadd.s32 %v229_v8, %v223_v30  ;;  %vm232_vm1 = vc.u32 %v230_v48, %v226_v34  ;;  %v227_v5 = vshrl.u32 %v222_v19, 16 }
  0x4f   :  { %v209_v50 = vadd.s32 %v207_v46, %v201_v22  ;;  %vm210_vm0 = vc.u32 %v208_v44, %v204_v40  ;;  %v233_v60 = vsel %vm232_vm1, 1, %v1686_v9  ;;  %v1947_v6 = vadd.s32 %v230_v48, %v226_v34 }
  0x50   :  { %v211_v51 = vsel %vm210_vm0, 1, %v1686_v9  ;;  %v235_v62 = vadd.s32 %v233_v60, %v231_v54  ;;  %v328_v7 = vor.u32 %v327_v61, %v326_v27  ;;  %v331_v13 = vor.u32 %v330_v0, %v329_v33 }
  0x51   :  { %v213_v41 = vadd.s32 %v211_v51, %v209_v50  ;;  %vm334_vm4 = vcmp.lt.s32.totalorder %v1905_v32, 3  ;;  %v340_v47 = vsel %vm332_vm2, %v1933_v11, %v1936_v57  ;;  %v184_v19 = vsel %vm178_vm13, %v181_v2, %v183_v36 }
  0x52   :  { %v236_v10 = vadd.s32 %v235_v62, %v225_v45  ;;  %v341_v18 = vsel %vm335_vm3, %v328_v7, 920167782  ;;  %vm333_vm5 = vcmp.lt.s32.totalorder %v1905_v32, 2  ;;  %v344_v28 = vsel %vm332_vm2, %v1936_v57, %v325_v63 }
  0x53   :  { %v214_v4 = vadd.s32 %v213_v41, %v203_v38  ;;  %v342_v22 = vsel %vm334_vm4, %v325_v63, %v341_v18  ;;  %v349_v30 = vand.u32 65535, %v1866_v12  ;;  %v345_v2 = vsel %vm335_vm3, %v331_v13, 1326507024 }
  0x54   :  { %v237_v21 = vadd.s32 %v236_v10, %v227_v5  ;;  %v343_v24 = vsel %vm333_vm5, %v340_v47, %v342_v22  ;;  %v238_v40 = vmul.u32 %v1857_v1, %v184_v19  ;;  %v455_v43 = vand.u32 2147483647, %v1835_v56 }
  0x55   :  { %v1951_v16 = vadd.s32 %v214_v4, %v205_v42  ;;  %v373_v36 = vand.u32 65535, %v343_v24  ;;  %v374_v38 = vshrl.u32 %v343_v24, 16  ;;  %v346_v42 = vsel %vm334_vm4, %v328_v7, %v345_v2 }
  0x56   :  { %v241_v14 = vadd.s32 1, %v237_v21  ;;  %v347_v45 = vsel %vm333_vm5, %v344_v28, %v346_v42  ;;  %v350_v34 = vshrl.u32 %v1866_v12, 16  ;;  %v465_v8 = vadd.s32 1, %v1889_v35 }
  0x57   :  { %vm240_vm6 = vc.u32 %v1951_v16, %v1947_v6  ;;  %v376_v46 = vmul.u32 %v374_v38, %v349_v30  ;;  %v351_v49 = vand.u32 65535, %v347_v45  ;;  %v352_v50 = vshrl.u32 %v347_v45, 16 }
  0x58   :  { %v242_v44 = vsel %vm240_vm6, %v241_v14, %v237_v21  ;;  %v375_v51 = vmul.u32 %v373_v36, %v349_v30  ;;  %v377_v54 = vmul.u32 %v373_v36, %v350_v34  ;;  %v337_v61 = vsel %vm335_vm3, %v325_v63, 2102212464 }
  0x59   :  { %v243_v48 = vadd.s32 %v242_v44, %v238_v40  ;;  %v379_v1 = vshll.u32 %v376_v46, 16  ;;  %v354_v60 = vmul.u32 %v352_v50, %v349_v30  ;;  %v355_v27 = vmul.u32 %v351_v49, %v350_v34 }
  0x5a   :  { %v378_v62 = vmul.u32 %v374_v38, %v350_v34  ;;  %v1987_v33 = vand.u32 8388607, %v455_v43  ;;  %v353_v4 = vmul.u32 %v351_v49, %v349_v30  ;;  %vm466_vm8 = vcmp.gt.s32.totalorder %v465_v8, 0 }
  0x5b   :  { %v244_v41 = vadd.s32 536870912, %v243_v48  ;;  %vm383_vm7 = vc.u32 %v375_v51, %v379_v1  ;;  %v357_v5 = vshll.u32 %v354_v60, 16  ;;  %v356_v35 = vmul.u32 %v352_v50, %v350_v34 }
  0x5c   :  { %v381_v7 = vshll.u32 %v377_v54, 16  ;;  %v384_v10 = vsel %vm383_vm7, 1, %v1686_v9  ;;  %v385_v13 = vadd.s32 %v379_v1, %v375_v51  ;;  %v359_v18 = vshll.u32 %v355_v27, 16 }
  0x5d   :  { %v1989_v0 = vshrl.u32 %v244_v41, 30  ;;  %vm361_vm9 = vc.u32 %v353_v4, %v357_v5  ;;  %v363_v63 = vadd.s32 %v357_v5, %v353_v4  ;;  %v316_v19 = vshrl.u32 %v1688_v15, %v1893_v52 }
  0x5e   :  { %v362_v21 = vsel %vm361_vm9, 1, %v1686_v9  ;;  %v386_v22 = vadd.s32 %v384_v10, %v378_v62  ;;  %vm387_vm10 = vc.u32 %v385_v13, %v381_v7  ;;  %v467_v30 = vsel %vm466_vm8, %v465_v8, 0 }
  0x5f   :  { %v246_v47 = vshll.u32 %v1989_v0, 30  ;;  %v364_v28 = vadd.s32 %v362_v21, %v356_v35  ;;  %vm365_vm11 = vc.u32 %v363_v63, %v359_v18  ;;  %v336_v14 = vsel %vm332_vm2, %v316_v19, %v1933_v11 }
  0x60   :  { %v338_v2 = vsel %vm334_vm4, %v1936_v57, %v337_v61  ;;  %v366_v36 = vsel %vm365_vm11, 1, %v1686_v9  ;;  %v388_v52 = vsel %vm387_vm10, 1, %v1686_v9  ;;  %v358_v40 = vshrl.u32 %v354_v60, 16 }
  0x61   :  { %v247_v24 = vsub.s32 %v243_v48, %v246_v47  ;;  %v368_v42 = vadd.s32 %v366_v36, %v364_v28  ;;  %v380_v44 = vshrl.u32 %v376_v46, 16  ;;  %v390_v45 = vadd.s32 %v388_v52, %v386_v22 }
  0x62   :  { %v469_v34 = vand.u32 31, %v467_v30  ;;  %v339_v49 = vsel %vm333_vm5, %v336_v14, %v338_v2  ;;  %v360_v11 = vshrl.u32 %v355_v27, 16  ;;  %v382_v51 = vshrl.u32 %v377_v54, 16 }
  0x63   :  { %vm248_vm12 = vcmp.lt.s32.totalorder %v247_v24, 0  ;;  %v249_v38 = vsub.s32 0, %v247_v24  ;;  %v369_v50 = vadd.s32 %v368_v42, %v358_v40  ;;  %v391_v57 = vadd.s32 %v390_v45, %v380_v44 }
  0x64   :  { %v2007_v1 = vsub.s32 32, %v469_v34  ;;  %v239_v41 = vadd.s32 %v1947_v6, %v1951_v16  ;;  %v2013_v60 = vadd.s32 %v385_v13, %v381_v7  ;;  %v463_v46 = vor.u32 8388608, %v1987_v33 }
  0x65   :  { %v250_v48 = vsel %vm248_vm12, %v249_v38, %v247_v24  ;;  %v2011_v61 = vadd.s32 %v369_v50, %v360_v11  ;;  %v392_v4 = vadd.s32 %v391_v57, %v382_v51  ;;  %v472_v32 = vshll.u32 %v1688_v15, %v469_v34 }
  0x66   :  { %v251_v8 = vclz %v250_v48  ;;  %v473_v27 = vshrl.u32 %v1689_v17, %v2007_v1  ;;  %v393_v54 = vmul.u32 %v1866_v12, %v339_v49  ;;  %v475_v6 = vshll.u32 %v1689_v17, %v469_v34 }
  0x67   :  { %vm395_vm13 = vc.u32 %v2011_v61, %v2013_v60  ;;  %v476_v16 = vshrl.u32 %v1690_v20, %v2007_v1  ;;  %v396_v5 = vadd.s32 1, %v392_v4  ;;  %v2025_v33 = vshrl.u32 %v467_v30, 5 }
  0x68   :  { %v1470_v62 = vadd.s32 4294967294, %v251_v8  ;;  %v2027_v35 = vor.u32 %v473_v27, %v472_v32  ;;  %v478_v13 = vshll.u32 %v1690_v20, %v469_v34  ;;  %v479_v12 = vshrl.u32 %v1691_v23, %v2007_v1 }
  0x69   :  { %v2029_v10 = vor.u32 %v476_v16, %v475_v6  ;;  %v397_v63 = vsel %vm395_vm13, %v396_v5, %v392_v4  ;;  %v481_v19 = vshll.u32 %v1691_v23, %v469_v34  ;;  %v482_v30 = vshrl.u32 %v2950_v29, %v2007_v1 }
  0x6a   :  { %vm1471_vm14 = vcmp.lt.s32.totalorder %v1470_v62, 0  ;;  %v398_v22 = vadd.s32 %v397_v63, %v393_v54  ;;  %v2035_v28 = vor.u32 %v479_v12, %v478_v13  ;;  %v484_v36 = vshll.u32 %v2950_v29, %v469_v34 }
  0x6b   :  { %v254_v7 = vsel %vm1471_vm14, 0, %v1470_v62  ;;  %v485_v52 = vshrl.u32 %v2948_v39, %v2007_v1  ;;  %v483_v40 = vor.u32 %v482_v30, %v481_v19  ;;  %v2042_v42 = vshll.u32 %v463_v46, 8 }
  0x6c   :  { %v255_v47 = vsub.s32 32, %v254_v7  ;;  %v259_v18 = vsub.s32 4294967266, %v254_v7  ;;  %v256_v21 = vshll.u32 %v247_v24, %v254_v7  ;;  %v399_v38 = vadd.s32 536870912, %v398_v22 }
  0x6d   :  { %v486_v24 = vor.u32 %v485_v52, %v484_v36  ;;  %vm490_vm15 = vcmp.lt.s32.totalorder %v2025_v33, 4  ;;  %vm487_vm0 = vcmp.lt.s32.totalorder %v2025_v33, 1  ;;  %vm489_vm1 = vcmp.lt.s32.totalorder %v2025_v33, 3 }
  0x6e   :  { %v257_v14 = vshrl.u32 %v239_v41, %v255_v47  ;;  %v260_v2 = vadd.s32 127, %v259_v18  ;;  %v2045_v48 = vshrl.u32 %v399_v38, 30  ;;  %v496_v34 = vsel %vm490_vm15, %v483_v40, 920167782 }
  0x6f   :  { %v495_v11 = vsel %vm487_vm0, %v2027_v35, %v2029_v10  ;;  %v497_v50 = vsel %vm489_vm1, %v2035_v28, %v496_v34  ;;  %v499_v8 = vsel %vm487_vm0, %v2029_v10, %v2035_v28  ;;  %v500_v57 = vsel %vm490_vm15, %v486_v24, 1326507024 }
  0x70   :  { %v258_v44 = vor.u32 %v257_v14, %v256_v21  ;;  %v261_v45 = vshll.u32 %v260_v2, 23  ;;  %v401_v51 = vshll.u32 %v2045_v48, 30  ;;  %vm488_vm2 = vcmp.lt.s32.totalorder %v2025_v33, 2 }
  0x71   :  { %v501_v62 = vsel %vm489_vm1, %v483_v40, %v500_v57  ;;  %v498_v32 = vsel %vm488_vm2, %v495_v11, %v497_v50  ;;  %v504_v6 = vand.u32 65535, %v2042_v42  ;;  %v505_v13 = vshrl.u32 %v2042_v42, 16 }
  0x72   :  { %v262_v49 = vor.u32 4788187, %v261_v45  ;;  %v265_v46 = vcvt.s32.f32 %v258_v44  ;;  %v402_v4 = vsub.s32 %v398_v22, %v401_v51  ;;  %v502_v27 = vsel %vm488_vm2, %v499_v8, %v501_v62 }
  0x73   :  { %v506_v16 = vand.u32 65535, %v502_v27  ;;  %v507_v5 = vshrl.u32 %v502_v27, 16  ;;  %v1287_v12 = vand.u32 2139095040, %v1723_v3  ;;  %vm147_vm4 = vcmp.lt.s32.totalorder %v1828_v53, 0 }
  0x74   :  { %v263_v41 = vand.u32 2147483647, %v262_v49  ;;  %vm403_vm3 = vcmp.lt.s32.totalorder %v402_v4, 0  ;;  %v404_v7 = vsub.s32 0, %v402_v4  ;;  %v529_v21 = vshrl.u32 %v498_v32, 16 }
  0x75   :  { %v509_v18 = vmul.u32 %v507_v5, %v504_v6  ;;  %v2076_v19 = vmul.u32 %v506_v16, %v505_v13  ;;  %vm2080_vm5 = vcmp.le.f32.partialorder %v145_v25, 0.7853982  ;;  %v2945_v36 = vand.u32 2147483647, %v1723_v3 }
  0x76   :  { %v266_v54 = vmul.f32 %v265_v46, %v263_v41  ;;  %v405_v63 = vsel %vm403_vm3, %v404_v7, %v402_v4  ;;  %v508_v38 = vmul.u32 %v506_v16, %v504_v6  ;;  %v511_v44 = vmul.u32 %v507_v5, %v505_v13 }
  0x77   :  { %v406_v14 = vclz %v405_v63  ;;  %v512_v2 = vshll.u32 %v509_v18, 16  ;;  %v528_v45 = vand.u32 65535, %v498_v32  ;;  %v514_v24 = vshll.u32 %v2076_v19, 16 }
  0x78   :  { %v267_v47 = vxor.u32 2147483648, %v266_v54  ;;  %v531_v49 = vmul.u32 %v529_v21, %v504_v6  ;;  %v1288_v11 = vshrl.u32 %v1287_v12, 23  ;;  %v2101_v51 = vand.u32 8388607, %v2945_v36 }
  0x79   :  { %v1473_v25 = vadd.s32 4294967294, %v406_v14  ;;  %vm516_vm6 = vc.u32 %v508_v38, %v512_v2  ;;  %v518_v34 = vadd.s32 %v512_v2, %v508_v38  ;;  %v394_v62 = vadd.s32 %v2013_v60, %v2011_v61 }
  0x7a   :  { %v268_v30 = vsel %vm147_vm4, %v267_v47, %v266_v54  ;;  %v517_v8 = vsel %vm516_vm6, 1, %v1686_v9  ;;  %v532_v27 = vmul.u32 %v528_v45, %v505_v13  ;;  %v530_v5 = vmul.u32 %v528_v45, %v504_v6 }
  0x7b   :  { %v2090_v52 = vsel %vm2080_vm5, %v1828_v53, %v268_v30  ;;  %vm1474_vm7 = vcmp.lt.s32.totalorder %v1473_v25, 0  ;;  %v519_v41 = vadd.s32 %v517_v8, %v511_v44  ;;  %vm520_vm8 = vc.u32 %v518_v34, %v514_v24 }
  0x7c   :  { %v2094_v40 = vmul.f32 %v2090_v52, %v2090_v52  ;;  %v409_v57 = vsel %vm1474_vm7, 0, %v1473_v25  ;;  %v521_v16 = vsel %vm520_vm8, 1, %v1686_v9  ;;  %v534_v7 = vshll.u32 %v531_v49, 16 }
  0x7d   :  { %v410_v32 = vsub.s32 32, %v409_v57  ;;  %v414_v54 = vsub.s32 4294967266, %v409_v57  ;;  %v1504_v12 = vadd.s32 4294967169, %v1288_v11  ;;  %v523_v30 = vadd.s32 %v521_v16, %v519_v41 }
  0x7e   :  { %v281_v50 = vmul.f32 -0.00019511016, %v2094_v40  ;;  %v274_v47 = vmul.f32 -0.001358992, %v2094_v40  ;;  %v411_v2 = vshll.u32 %v402_v4, %v409_v57  ;;  %vm538_vm9 = vc.u32 %v530_v5, %v534_v7 }
  0x7f   :  { %v412_v63 = vshrl.u32 %v394_v62, %v410_v32  ;;  %v415_v38 = vadd.s32 127, %v414_v54  ;;  %v269_v25 = vsub.s32 4, %v1989_v0  ;;  %v513_v61 = vshrl.u32 %v509_v18, 16 }
  0x80   :  { %v282_v46 = vadd.f32 0.008332121, %v281_v50  ;;  %v533_v60 = vmul.u32 %v529_v21, %v505_v13  ;;  %v536_v44 = vshll.u32 %v532_v27, 16  ;;  %v539_v6 = vsel %vm538_vm9, 1, %v1686_v9 }
  0x81   :  { %v413_v24 = vor.u32 %v412_v63, %v411_v2  ;;  %v416_v34 = vshll.u32 %v415_v38, 23  ;;  %v540_v45 = vadd.s32 %v534_v7, %v530_v5  ;;  %v275_v11 = vadd.f32 0.041655596, %v274_v47 }
  0x82   :  { %v283_v14 = vmul.f32 %v282_v46, %v2094_v40  ;;  %v471_v50 = vshrl.u32 %v1688_v15, %v2007_v1  ;;  %v492_v4 = vsel %vm490_vm15, %v2035_v28, 2102212464  ;;  %v524_v8 = vadd.s32 %v523_v30, %v513_v61 }
  0x83   :  { %v417_v41 = vor.u32 4788187, %v416_v34  ;;  %v541_v46 = vadd.s32 %v539_v6, %v533_v60  ;;  %vm542_vm10 = vc.u32 %v540_v45, %v536_v44  ;;  %v270_v13 = vsel %vm147_vm4, %v269_v25, %v1989_v0 }
  0x84   :  { %v284_v57 = vadd.f32 -0.16666654, %v283_v14  ;;  %v491_v18 = vsel %vm487_vm0, %v471_v50, %v2027_v35  ;;  %v515_v21 = vshrl.u32 %v2076_v19, 16  ;;  %v543_v1 = vsel %vm542_vm10, 1, %v1686_v9 }
  0x85   :  { %v418_v62 = vand.u32 2147483647, %v417_v41  ;;  %v420_v32 = vcvt.s32.f32 %v413_v24  ;;  %v535_v28 = vshrl.u32 %v531_v49, 16  ;;  %v545_v54 = vadd.s32 %v543_v1, %v541_v46 }
  0x86   :  { %v276_v16 = vmul.f32 %v275_v11, %v2094_v40  ;;  %v493_v5 = vsel %vm489_vm1, %v2029_v10, %v492_v4  ;;  %v2127_v7 = vadd.s32 %v524_v8, %v515_v21  ;;  %v537_v0 = vshrl.u32 %v532_v27, 16 }
  0x87   :  { %v285_v47 = vmul.f32 %v284_v57, %v2094_v40  ;;  %v421_v35 = vmul.f32 %v420_v32, %v418_v62  ;;  %v546_v63 = vadd.s32 %v545_v54, %v535_v28  ;;  %v613_v19 = vand.u32 2139095040, %v1838_v37 }
  0x88   :  { %v1292_v30 = vor.u32 8388608, %v2101_v51  ;;  %v1294_v14 = vadd.s32 1, %v1504_v12  ;;  %v544_v49 = vadd.s32 %v540_v45, %v536_v44  ;;  %v2947_v2 = vand.u32 2147483647, %v1838_v37 }
  0x89   :  { %v422_v38 = vxor.u32 2147483648, %v421_v35  ;;  %v494_v25 = vsel %vm488_vm2, %v491_v18, %v493_v5  ;;  %v547_v10 = vadd.s32 %v546_v63, %v537_v0  ;;  %v614_v61 = vshrl.u32 %v613_v19, 23 }
  0x8a   :  { %v272_v27 = vsel %vm2080_vm5, 0, %v270_v13  ;;  %v277_v60 = vadd.f32 -0.4999988, %v276_v16  ;;  %vm302_vm11 = vcmp.lt.s32.totalorder %v1832_v55, 0  ;;  %vm550_vm12 = vc.u32 %v2127_v7, %v544_v49 }
  0x8b   :  { %v286_v24 = vadd.f32 1.0, %v285_v47  ;;  %v423_v51 = vsel %vm302_vm11, %v422_v38, %v421_v35  ;;  %v551_v12 = vadd.s32 1, %v547_v10  ;;  %v1478_v44 = vadd.s32 4294967169, %v614_v61 }
  0x8c   :  { %vm1295_vm13 = vcmp.gt.s32.totalorder %v1294_v14, 0  ;;  %v548_v33 = vmul.u32 %v2042_v42, %v494_v25  ;;  %v617_v34 = vand.u32 8388607, %v2947_v2  ;;  %vm2146_vm14 = vcmp.le.f32.partialorder %v300_v31, 0.7853982 }
  0x8d   :  { %v424_v6 = vsub.s32 4, %v2045_v48  ;;  %v552_v45 = vsel %vm550_vm12, %v551_v12, %v547_v10  ;;  %v620_v11 = vadd.s32 1, %v1478_v44  ;;  %v2151_v50 = vshll.u32 %v1292_v30, 8 }
  0x8e   :  { %v289_v4 = vadd.s32 3, %v272_v27  ;;  %v2156_v42 = vsel %vm2146_vm14, %v1832_v55, %v423_v51  ;;  %v553_v8 = vadd.s32 %v552_v45, %v548_v33  ;;  %v1296_v57 = vsel %vm1295_vm13, %v1294_v14, 0 }
  0x8f   :  { %v278_v41 = vmul.f32 %v277_v60, %v2094_v40  ;;  %v2160_v31 = vmul.f32 %v286_v24, %v2090_v52  ;;  %vm621_vm15 = vcmp.gt.s32.totalorder %v620_v11, 0  ;;  %v618_v13 = vor.u32 8388608, %v617_v34 }
  0x90   :  { %v554_v46 = vadd.s32 536870912, %v553_v8  ;;  %v622_v18 = vsel %vm621_vm15, %v620_v11, 0  ;;  %v425_v21 = vsel %vm302_vm11, %v424_v6, %v2045_v48  ;;  %v2167_v1 = vmul.f32 %v2156_v42, %v2156_v42 }
  0x91   :  { %v624_v62 = vand.u32 31, %v622_v18  ;;  %v2169_v32 = vand.u32 31, %v1296_v57  ;;  %v2171_v28 = vand.u32 3, %v289_v4  ;;  %v2175_v52 = vshrl.u32 %v1296_v57, 5 }
  0x92   :  { %v2173_v40 = vshrl.u32 %v554_v46, 30  ;;  %v2178_v54 = vand.u32 65535, %v2151_v50  ;;  %v2180_v16 = vadd.f32 1.0, %v278_v41  ;;  %v293_v48 = vxor.u32 2147483648, %v2160_v31 }
  0x93   :  { %v427_v5 = vsel %vm2146_vm14, 0, %v425_v21  ;;  %v2186_v47 = vshll.u32 %v618_v13, 8  ;;  %v768_v35 = vand.u32 2139095040, %v1841_v58  ;;  %v2190_v63 = vshrl.u32 %v2151_v50, 16 }
  0x94   :  { %v556_v0 = vshll.u32 %v2173_v40, 30  ;;  %v429_v19 = vmul.f32 -0.001358992, %v2167_v1  ;;  %v625_v30 = vsub.s32 32, %v624_v62  ;;  %v2946_v14 = vand.u32 2147483647, %v1841_v58 }
  0x95   :  { %v2195_v38 = vsub.s32 32, %v2169_v32  ;;  %vm292_vm0 = vcmp.eq.s32.totalorder %v2171_v28, 0  ;;  %v436_v25 = vmul.f32 -0.00019511016, %v2167_v1  ;;  %v2203_v60 = vadd.s32 3, %v427_v5 }
  0x96   :  { %v557_v10 = vsub.s32 %v553_v8, %v556_v0  ;;  %v2200_v61 = vsel %vm292_vm0, %v2180_v16, %v293_v48  ;;  %v549_v24 = vadd.s32 %v544_v49, %v2127_v7  ;;  %v2207_v12 = vand.u32 65535, %v2186_v47 }
  0x97   :  { %v769_v44 = vshrl.u32 %v768_v35, 23  ;;  %v430_v33 = vadd.f32 0.041655596, %v429_v19  ;;  %v628_v34 = vshrl.u32 %v1689_v17, %v625_v30  ;;  %v631_v22 = vshrl.u32 %v1690_v20, %v625_v30 }
  0x98   :  { %vm558_vm1 = vcmp.lt.s32.totalorder %v557_v10, 0  ;;  %v559_v51 = vsub.s32 0, %v557_v10  ;;  %v2213_v6 = vand.u32 8388607, %v2946_v14  ;;  %v437_v45 = vadd.f32 0.008332121, %v436_v25 }
  0x99   :  { %v634_v4 = vshrl.u32 %v1691_v23, %v625_v30  ;;  %v637_v7 = vshrl.u32 %v2950_v29, %v625_v30  ;;  %v627_v8 = vshll.u32 %v1688_v15, %v624_v62  ;;  %v630_v57 = vshll.u32 %v1689_v17, %v624_v62 }
  0x9a   :  { %v560_v11 = vsel %vm558_vm1, %v559_v51, %v557_v10  ;;  %v640_v41 = vshrl.u32 %v2948_v39, %v625_v30  ;;  %v2220_v46 = vshrl.u32 %v622_v18, 5  ;;  %v633_v13 = vshll.u32 %v1690_v20, %v624_v62 }
  0x9b   :  { %v561_v49 = vclz %v560_v11  ;;  %v636_v21 = vshll.u32 %v1691_v23, %v624_v62  ;;  %v639_v48 = vshll.u32 %v2950_v29, %v624_v62  ;;  %v629_v0 = vor.u32 %v628_v34, %v627_v8 }
  0x9c   :  { %v2225_v35 = vor.u32 %v631_v22, %v630_v57  ;;  %v660_v19 = vshrl.u32 %v2186_v47, 16  ;;  %v635_v25 = vor.u32 %v634_v4, %v633_v13  ;;  %v1481_v36 = vadd.s32 4294967169, %v769_v44 }
  0x9d   :  { %v1476_v5 = vadd.s32 4294967294, %v561_v49  ;;  %v638_v51 = vor.u32 %v637_v7, %v636_v21  ;;  %v641_v11 = vor.u32 %v640_v41, %v639_v48  ;;  %v431_v14 = vmul.f32 %v430_v33, %v2167_v1 }
  0x9e   :  { %v438_v18 = vmul.f32 %v437_v45, %v2167_v1  ;;  %vm642_vm3 = vcmp.lt.s32.totalorder %v2220_v46, 1  ;;  %vm643_vm4 = vcmp.lt.s32.totalorder %v2220_v46, 2  ;;  %vm644_vm5 = vcmp.lt.s32.totalorder %v2220_v46, 3 }
  0x9f   :  { %vm1477_vm2 = vcmp.lt.s32.totalorder %v1476_v5, 0  ;;  %vm645_vm6 = vcmp.lt.s32.totalorder %v2220_v46, 4  ;;  %v650_v44 = vsel %vm642_vm3, %v629_v0, %v2225_v35  ;;  %v654_v45 = vsel %vm642_vm3, %v2225_v35, %v635_v25 }
  0xa0   :  { %v564_v27 = vsel %vm1477_vm2, 0, %v1476_v5  ;;  %v651_v22 = vsel %vm645_vm6, %v638_v51, 920167782  ;;  %v655_v4 = vsel %vm645_vm6, %v641_v11, 1326507024  ;;  %v775_v13 = vadd.s32 1, %v1481_v36 }
  0xa1   :  { %v565_v62 = vsub.s32 32, %v564_v27  ;;  %v569_v34 = vsub.s32 4294967266, %v564_v27  ;;  %v566_v33 = vshll.u32 %v557_v10, %v564_v27  ;;  %v652_v8 = vsel %vm644_vm5, %v635_v25, %v651_v22 }
  0xa2   :  { %v656_v57 = vsel %vm644_vm5, %v638_v51, %v655_v4  ;;  %v626_v10 = vshrl.u32 %v1688_v15, %v625_v30  ;;  %v653_v27 = vsel %vm643_vm4, %v650_v44, %v652_v8  ;;  %v2254_v11 = vadd.f32 -0.4999988, %v431_v14 }
  0xa3   :  { %v567_v7 = vshrl.u32 %v549_v24, %v565_v62  ;;  %v570_v49 = vadd.s32 127, %v569_v34  ;;  %v657_v41 = vsel %vm643_vm4, %v654_v45, %v656_v57  ;;  %vm457_vm7 = vcmp.lt.s32.totalorder %v1835_v56, 0 }
  0xa4   :  { %v661_v5 = vand.u32 65535, %v657_v41  ;;  %v662_v24 = vshrl.u32 %v657_v41, 16  ;;  %v579_v62 = vsub.s32 4, %v2173_v40  ;;  %v683_v51 = vand.u32 65535, %v653_v27 }
  0xa5   :  { %v568_v21 = vor.u32 %v567_v7, %v566_v33  ;;  %v571_v48 = vshll.u32 %v570_v49, 23  ;;  %v684_v34 = vshrl.u32 %v653_v27, 16  ;;  %v439_v30 = vadd.f32 -0.16666654, %v438_v18 }
  0xa6   :  { %vm2260_vm8 = vcmp.le.f32.partialorder %v455_v43, 0.7853982  ;;  %v646_v33 = vsel %vm642_vm3, %v626_v10, %v629_v0  ;;  %v664_v14 = vmul.u32 %v662_v24, %v2207_v12  ;;  %v647_v22 = vsel %vm645_vm6, %v635_v25, 2102212464 }
  0xa7   :  { %v572_v36 = vor.u32 4788187, %v571_v48  ;;  %v665_v45 = vmul.u32 %v661_v5, %v660_v19  ;;  %v686_v4 = vmul.u32 %v684_v34, %v2207_v12  ;;  %vm776_vm9 = vcmp.gt.s32.totalorder %v775_v13, 0 }
  0xa8   :  { %v575_v7 = vcvt.s32.f32 %v568_v21  ;;  %v663_v43 = vmul.u32 %v661_v5, %v2207_v12  ;;  %v667_v49 = vshll.u32 %v664_v14, 16  ;;  %v666_v8 = vmul.u32 %v662_v24, %v660_v19 }
  0xa9   :  { %v573_v18 = vand.u32 2147483647, %v572_v36  ;;  %v685_v57 = vmul.u32 %v683_v51, %v2207_v12  ;;  %v687_v27 = vmul.u32 %v683_v51, %v660_v19  ;;  %v689_v41 = vshll.u32 %v686_v4, 16 }
  0xaa   :  { %v669_v10 = vshll.u32 %v665_v45, 16  ;;  %vm671_vm10 = vc.u32 %v663_v43, %v667_v49  ;;  %v673_v48 = vadd.s32 %v667_v49, %v663_v43  ;;  %v688_v2 = vmul.u32 %v684_v34, %v660_v19 }
  0xab   :  { %v576_v0 = vmul.f32 %v575_v7, %v573_v18  ;;  %v672_v25 = vsel %vm671_vm10, 1, %v1686_v9  ;;  %vm693_vm11 = vc.u32 %v685_v57, %v689_v41  ;;  %v777_v39 = vsel %vm776_vm9, %v775_v13, 0 }
  0xac   :  { %v674_v21 = vadd.s32 %v672_v25, %v666_v8  ;;  %vm675_vm12 = vc.u32 %v673_v48, %v669_v10  ;;  %v694_v5 = vsel %vm693_vm11, 1, %v1686_v9  ;;  %v691_v12 = vshll.u32 %v687_v27, 16 }
  0xad   :  { %v577_v36 = vxor.u32 2147483648, %v576_v0  ;;  %v676_v24 = vsel %vm675_vm12, 1, %v1686_v9  ;;  %v695_v51 = vadd.s32 %v689_v41, %v685_v57  ;;  %v696_v29 = vadd.s32 %v694_v5, %v688_v2 }
  0xae   :  { %v668_v7 = vshrl.u32 %v664_v14, 16  ;;  %v678_v43 = vadd.s32 %v676_v24, %v674_v21  ;;  %v779_v49 = vand.u32 31, %v777_v39  ;;  %v648_v13 = vsel %vm644_vm5, %v2225_v35, %v647_v22 }
  0xaf   :  { %v578_v18 = vsel %vm457_vm7, %v577_v36, %v576_v0  ;;  %v670_v34 = vshrl.u32 %v665_v45, 16  ;;  %vm697_vm13 = vc.u32 %v695_v51, %v691_v12  ;;  %v440_v41 = vmul.f32 %v439_v30, %v2167_v1 }
  0xb0   :  { %v2281_v19 = vsel %vm2260_vm8, %v1835_v56, %v578_v18  ;;  %v679_v8 = vadd.s32 %v678_v43, %v668_v7  ;;  %v698_v14 = vsel %vm697_vm13, 1, %v1686_v9  ;;  %v2291_v57 = vsub.s32 32, %v779_v49 }
  0xb1   :  { %v2288_v2 = vmul.f32 %v2281_v19, %v2281_v19  ;;  %v580_v0 = vsel %vm457_vm7, %v579_v62, %v2173_v40  ;;  %v690_v10 = vshrl.u32 %v686_v4, 16  ;;  %v700_v48 = vadd.s32 %v698_v14, %v696_v29 }
  0xb2   :  { %v649_v22 = vsel %vm643_vm4, %v646_v33, %v648_v13  ;;  %v2300_v45 = vadd.s32 %v679_v8, %v670_v34  ;;  %v692_v25 = vshrl.u32 %v687_v27, 16  ;;  %v2302_v21 = vshrl.u32 %v777_v39, 5 }
  0xb3   :  { %v591_v35 = vmul.f32 -0.00019511016, %v2288_v2  ;;  %v701_v36 = vadd.s32 %v700_v48, %v690_v10  ;;  %v783_v30 = vshrl.u32 %v1689_v17, %v2291_v57  ;;  %v786_v5 = vshrl.u32 %v1690_v20, %v2291_v57 }
  0xb4   :  { %v2308_v62 = vadd.s32 %v695_v51, %v691_v12  ;;  %v782_v29 = vshll.u32 %v1688_v15, %v779_v49  ;;  %v785_v46 = vshll.u32 %v1689_v17, %v779_v49  ;;  %v584_v33 = vmul.f32 -0.001358992, %v2288_v2 }
  0xb5   :  { %v592_v40 = vadd.f32 0.008332121, %v591_v35  ;;  %v702_v4 = vadd.s32 %v701_v36, %v692_v25  ;;  %v788_v27 = vshll.u32 %v1690_v20, %v779_v49  ;;  %v789_v39 = vshrl.u32 %v1691_v23, %v2291_v57 }
  0xb6   :  { %vm295_vm14 = vcmp.eq.s32.totalorder %v2171_v28, 2  ;;  %vm705_vm15 = vc.u32 %v2300_v45, %v2308_v62  ;;  %v784_v24 = vor.u32 %v783_v30, %v782_v29  ;;  %v791_v12 = vshll.u32 %v1691_v23, %v779_v49 }
  0xb7   :  { %v2970_v51 = vmov 920167782   ;;  %vm291_vm0 = vcmp.lt.s32.totalorder %v2171_v28, 2  ;;  %v706_v7 = vadd.s32 1, %v702_v4  ;;  %v2323_v43 = vor.u32 %v786_v5, %v785_v46 }
  0xb8   :  { %v792_v18 = vshrl.u32 %v2970_v51, %v2291_v57  ;;  %v794_v13 = vshll.u32 %v2970_v51, %v779_v49  ;;  %v2971_v34 = vmov 1326507024   ;;  %v582_v14 = vsel %vm2260_vm8, 0, %v580_v0 }
  0xb9   :  { %v795_v8 = vshrl.u32 %v2971_v34, %v2291_v57  ;;  %v593_v10 = vmul.f32 %v592_v40, %v2288_v2  ;;  %v703_v48 = vmul.u32 %v2186_v47, %v649_v22  ;;  %v585_v25 = vadd.f32 0.041655596, %v584_v33 }
  0xba   :  { %v793_v35 = vor.u32 %v792_v18, %v791_v12  ;;  %v707_v36 = vsel %vm705_vm15, %v706_v7, %v702_v4  ;;  %v790_v30 = vor.u32 %v789_v39, %v788_v27  ;;  %v433_v5 = vmul.f32 %v2254_v11, %v2167_v1 }
  0xbb   :  { %v796_v29 = vor.u32 %v795_v8, %v794_v13  ;;  %v708_v46 = vadd.s32 %v707_v36, %v703_v48  ;;  %vm797_vm1 = vcmp.lt.s32.totalorder %v2302_v21, 1  ;;  %vm800_vm2 = vcmp.lt.s32.totalorder %v2302_v21, 4 }
  0xbc   :  { %v441_v49 = vadd.f32 1.0, %v440_v41  ;;  %v599_v44 = vadd.s32 3, %v582_v14  ;;  %v805_v0 = vsel %vm797_vm1, %v784_v24, %v2323_v43  ;;  %v806_v47 = vsel %vm800_vm2, %v793_v35, 920167782 }
  0xbd   :  { %v594_v22 = vadd.f32 -0.16666654, %v593_v10  ;;  %v709_v40 = vadd.s32 536870912, %v708_v46  ;;  %vm799_vm3 = vcmp.lt.s32.totalorder %v2302_v21, 3  ;;  %v2972_v1 = vor.u32 8388608, %v2213_v6 }
  0xbe   :  { %v586_v33 = vmul.f32 %v585_v25, %v2288_v2  ;;  %vm798_vm4 = vcmp.lt.s32.totalorder %v2302_v21, 2  ;;  %v807_v41 = vsel %vm799_vm3, %v790_v30, %v806_v47  ;;  %v810_v4 = vsel %vm800_vm2, %v796_v29, 1326507024 }
  0xbf   :  { %v2344_v11 = vshll.u32 %v2972_v1, 8  ;;  %v2353_v27 = vand.u32 3, %v2203_v60  ;;  %v2355_v39 = vshrl.u32 %v709_v40, 30  ;;  %v808_v6 = vsel %vm798_vm4, %v805_v0, %v807_v41 }
  0xc0   :  { %v809_v12 = vsel %vm797_vm1, %v2323_v43, %v790_v30  ;;  %v2973_v18 = vxor.u32 2147483648, %v2180_v16  ;;  %v2367_v13 = vadd.f32 1.0, %v433_v5  ;;  %v811_v60 = vsel %vm799_vm3, %v793_v35, %v810_v4 }
  0xc1   :  { %v839_v8 = vshrl.u32 %v808_v6, 16  ;;  %v595_v10 = vmul.f32 %v594_v22, %v2288_v2  ;;  %v711_v48 = vshll.u32 %v2355_v39, 30  ;;  %v814_v16 = vand.u32 65535, %v2344_v11 }
  0xc2   :  { %v297_v7 = vsel %vm295_vm14, %v2973_v18, %v2160_v31  ;;  %v2380_v25 = vmul.f32 %v441_v49, %v2156_v42  ;;  %v587_v31 = vadd.f32 -0.4999988, %v586_v33  ;;  %v2382_v36 = vand.u32 3, %v599_v44 }
  0xc3   :  { %v2374_v14 = vsel %vm291_vm0, %v2200_v61, %v297_v7  ;;  %v812_v35 = vsel %vm798_vm4, %v809_v12, %v811_v60  ;;  %v2386_v29 = vsub.s32 %v708_v46, %v711_v48  ;;  %v838_v61 = vand.u32 65535, %v808_v6 }
  0xc4   :  { %v816_v28 = vand.u32 65535, %v812_v35  ;;  %v2388_v5 = vmul.u32 %v839_v8, %v814_v16  ;;  %v451_v0 = vxor.u32 2147483648, %v2367_v13  ;;  %v781_v47 = vshrl.u32 %v1688_v15, %v2291_v57 }
  0xc5   :  { %v815_v42 = vshrl.u32 %v2344_v11, 16  ;;  %v817_v49 = vshrl.u32 %v812_v35, 16  ;;  %v596_v22 = vadd.f32 1.0, %v595_v10  ;;  %vm713_vm5 = vcmp.lt.s32.totalorder %v2386_v29, 0 }
  0xc6   :  { %v714_v44 = vsub.s32 0, %v2386_v29  ;;  %v802_v46 = vsel %vm800_vm2, %v790_v30, 2102212464  ;;  %v704_v40 = vadd.s32 %v2308_v62, %v2300_v45  ;;  %v801_v1 = vsel %vm797_vm1, %v781_v47, %v784_v24 }
  0xc7   :  { %v819_v33 = vmul.u32 %v817_v49, %v814_v16  ;;  %v820_v41 = vmul.u32 %v816_v28, %v815_v42  ;;  %v588_v57 = vmul.f32 %v587_v31, %v2288_v2  ;;  %v842_v6 = vmul.u32 %v838_v61, %v815_v42 }
  0xc8   :  { %v715_v4 = vsel %vm713_vm5, %v714_v44, %v2386_v29  ;;  %v844_v12 = vshll.u32 %v2388_v5, 16  ;;  %v803_v30 = vsel %vm799_vm3, %v2323_v43, %v802_v46  ;;  %v818_v7 = vmul.u32 %v816_v28, %v814_v16 }
  0xc9   :  { %v716_v18 = vclz %v715_v4  ;;  %v822_v60 = vshll.u32 %v819_v33, 16  ;;  %v2409_v45 = vmul.f32 %v596_v22, %v2281_v19  ;;  %v821_v62 = vmul.u32 %v817_v49, %v815_v42 }
  0xca   :  { %v840_v24 = vmul.u32 %v838_v61, %v814_v16  ;;  %v843_v10 = vmul.u32 %v839_v8, %v815_v42  ;;  %v824_v2 = vshll.u32 %v820_v41, 16  ;;  %v846_v47 = vshll.u32 %v842_v6, 16 }
  0xcb   :  { %v1479_v48 = vadd.s32 4294967294, %v716_v18  ;;  %vm826_vm6 = vc.u32 %v818_v7, %v822_v60  ;;  %v828_v31 = vadd.s32 %v822_v60, %v818_v7  ;;  %vm612_vm10 = vcmp.lt.s32.totalorder %v1838_v37, 0 }
  0xcc   :  { %v827_v35 = vsel %vm826_vm6, 1, %v1686_v9  ;;  %vm848_vm7 = vc.u32 %v840_v24, %v844_v12  ;;  %v850_v44 = vadd.s32 %v844_v12, %v840_v24  ;;  %vm447_vm12 = vcmp.eq.s32.totalorder %v2353_v27, 0 }
  0xcd   :  { %vm1480_vm8 = vcmp.lt.s32.totalorder %v1479_v48, 0  ;;  %v829_v4 = vadd.s32 %v827_v35, %v821_v62  ;;  %vm830_vm9 = vc.u32 %v828_v31, %v824_v2  ;;  %v849_v43 = vsel %vm848_vm7, 1, %v1686_v9 }
  0xce   :  { %v719_v19 = vsel %vm1480_vm8, 0, %v1479_v48  ;;  %v831_v16 = vsel %vm830_vm9, 1, %v1686_v9  ;;  %v851_v8 = vadd.s32 %v849_v43, %v843_v10  ;;  %vm852_vm11 = vc.u32 %v850_v44, %v846_v47 }
  0xcf   :  { %v720_v28 = vsub.s32 32, %v719_v19  ;;  %v724_v61 = vsub.s32 4294967266, %v719_v19  ;;  %v823_v42 = vshrl.u32 %v819_v33, 16  ;;  %v833_v49 = vadd.s32 %v831_v16, %v829_v4 }
  0xd0   :  { %v721_v22 = vshll.u32 %v2386_v29, %v719_v19  ;;  %v825_v46 = vshrl.u32 %v820_v41, 16  ;;  %v845_v12 = vshrl.u32 %v2388_v5, 16  ;;  %v853_v18 = vsel %vm852_vm11, 1, %v1686_v9 }
  0xd1   :  { %v2974_v7 = vand.u32 2147483647, %v1838_v37  ;;  %v722_v62 = vshrl.u32 %v704_v40, %v720_v28  ;;  %v725_v24 = vadd.s32 127, %v724_v61  ;;  %v834_v10 = vadd.s32 %v833_v49, %v823_v42 }
  0xd2   :  { %v855_v48 = vadd.s32 %v853_v18, %v851_v8  ;;  %v448_v33 = vxor.u32 2147483648, %v2380_v25  ;;  %vm450_vm14 = vcmp.eq.s32.totalorder %v2353_v27, 2  ;;  %v734_v29 = vsub.s32 4, %v2355_v39 }
  0xd3   :  { %vm2421_vm13 = vcmp.le.f32.partialorder %v2974_v7, 0.7853982  ;;  %v847_v41 = vshrl.u32 %v842_v6, 16  ;;  %v923_v5 = vand.u32 2139095040, %v1844_v59  ;;  %vm446_vm15 = vcmp.lt.s32.totalorder %v2353_v27, 2 }
  0xd4   :  { %v723_v2 = vor.u32 %v722_v62, %v721_v22  ;;  %v726_v31 = vshll.u32 %v725_v24, 23  ;;  %v835_v35 = vadd.s32 %v834_v10, %v825_v46  ;;  %v856_v4 = vadd.s32 %v855_v48, %v845_v12 }
  0xd5   :  { %v589_v43 = vadd.f32 1.0, %v588_v57  ;;  %v804_v40 = vsel %vm798_vm4, %v801_v1, %v803_v30  ;;  %v854_v19 = vadd.s32 %v850_v44, %v846_v47  ;;  %v924_v16 = vshrl.u32 %v923_v5, 23 }
  0xd6   :  { %v603_v8 = vxor.u32 2147483648, %v2409_v45  ;;  %v727_v28 = vor.u32 4788187, %v726_v31  ;;  %v857_v61 = vadd.s32 %v856_v4, %v847_v41  ;;  %v920_v6 = vand.u32 2147483647, %v1844_v59 }
  0xd7   :  { %vm601_vm0 = vcmp.lt.s32.totalorder %v2382_v36, 2  ;;  %vm602_vm1 = vcmp.eq.s32.totalorder %v2382_v36, 0  ;;  %vm860_vm2 = vc.u32 %v835_v35, %v854_v19  ;;  %v1484_v42 = vadd.s32 4294967169, %v924_v16 }
  0xd8   :  { %vm288_vm3 = vweird.f32 %v1828_v53  ;;  %v728_v57 = vand.u32 2147483647, %v727_v28  ;;  %v730_v49 = vcvt.s32.f32 %v723_v2  ;;  %v735_v21 = vsel %vm612_vm10, %v734_v29, %v2355_v39 }
  0xd9   :  { %v861_v1 = vadd.s32 1, %v857_v61  ;;  %v449_v30 = vsel %vm447_vm12, %v2367_v13, %v448_v33  ;;  %v606_v47 = vxor.u32 2147483648, %v589_v43  ;;  %v858_v44 = vmul.u32 %v2344_v11, %v804_v40 }
  0xda   :  { %v930_v22 = vadd.s32 1, %v1484_v42  ;;  %v604_v46 = vsel %vm602_vm1, %v589_v43, %v603_v8  ;;  %v731_v12 = vmul.f32 %v730_v49, %v728_v57  ;;  %v927_v7 = vand.u32 8388607, %v920_v6 }
  0xdb   :  { %v862_v18 = vsel %vm860_vm2, %v861_v1, %v857_v61  ;;  %v737_v62 = vsel %vm2421_vm13, 0, %v735_v21  ;;  %v1078_v39 = vand.u32 2139095040, %v1849_v26  ;;  %v452_v11 = vsel %vm450_vm14, %v451_v0, %v2380_v25 }
  0xdc   :  { %v863_v24 = vadd.s32 %v862_v18, %v858_v44  ;;  %vm931_vm4 = vcmp.gt.s32.totalorder %v930_v22, 0  ;;  %vm605_vm5 = vcmp.eq.s32.totalorder %v2382_v36, 2  ;;  %v732_v10 = vxor.u32 2147483648, %v731_v12 }
  0xdd   :  { %v932_v48 = vsel %vm931_vm4, %v930_v22, 0  ;;  %v453_v33 = vsel %vm446_vm15, %v449_v30, %v452_v11  ;;  %v607_v29 = vsel %vm605_vm5, %v606_v47, %v2409_v45  ;;  %v754_v31 = vadd.s32 3, %v737_v62 }
  0xde   :  { %v864_v41 = vadd.s32 536870912, %v863_v24  ;;  %v934_v5 = vand.u32 31, %v932_v48  ;;  %v608_v2 = vsel %vm601_vm0, %v604_v46, %v607_v29  ;;  %v733_v13 = vsel %vm612_vm10, %v732_v10, %v731_v12 }
  0xdf   :  { %v928_v4 = vor.u32 8388608, %v927_v7  ;;  %v2465_v25 = vsel %vm2421_vm13, %v1838_v37, %v733_v13  ;;  %v1075_v27 = vand.u32 2147483647, %v1849_v26  ;;  %v1079_v43 = vshrl.u32 %v1078_v39, 23 }
  0xe0   :  { %v865_v0 = vshrl.u32 %v864_v41, 30  ;;  %vm443_vm6 = vweird.f32 %v1832_v55  ;;  %vm598_vm7 = vweird.f32 %v1835_v56  ;;  %v2472_v36 = vmul.f32 %v2465_v25, %v2465_v25 }
  0xe1   :  { %v2474_v45 = vsub.s32 32, %v934_v5  ;;  %v2479_v60 = vsel %vm288_vm3, nan, %v2374_v14  ;;  %v2481_v40 = vsel %vm443_vm6, nan, %v453_v33  ;;  %vm767_vm8 = vcmp.lt.s32.totalorder %v1841_v58, 0 }
  0xe2   :  { %v866_v16 = vshll.u32 %v865_v0, 30  ;;  %v2484_v8 = vsel %vm598_vm7, nan, %v608_v2  ;;  %v739_v55 = vmul.f32 -0.001358992, %v2472_v36  ;;  %v2487_v56 = vand.u32 3, %v754_v31 }
  0xe3   :  { %v2977_v28 = vand.u32 2147483647, %v1841_v58  ;;  %v859_v53 = vadd.s32 %v854_v19, %v835_v35  ;;  %v2497_v42 = vshll.u32 %v928_v4, 8  ;;  %v1487_v57 = vadd.s32 4294967169, %v1079_v43 }
  0xe4   :  { %v2495_v14 = vsub.s32 %v863_v24, %v866_v16  ;;  %v2501_v49 = vand.u32 8388607, %v1075_v27  ;;  %v746_v21 = vmul.f32 -0.00019511016, %v2472_v36  ;;  %v889_v1 = vsub.s32 4, %v865_v0 }
  0xe5   :  { %vm2491_vm9 = vcmp.le.f32.partialorder %v2977_v28, 0.7853982  ;;  %v2504_v30 = vshrl.u32 %v932_v48, 5  ;;  %v938_v47 = vshrl.u32 %v1689_v17, %v2474_v45  ;;  %v941_v19 = vshrl.u32 %v1690_v20, %v2474_v45 }
  0xe6   :  { %vm868_vm10 = vcmp.lt.s32.totalorder %v2495_v14, 0  ;;  %v869_v35 = vsub.s32 0, %v2495_v14  ;;  %v947_v44 = vshrl.u32 %v2970_v51, %v2474_v45  ;;  %v740_v22 = vadd.f32 0.041655596, %v739_v55 }
  0xe7   :  { %v937_v46 = vshll.u32 %v1688_v15, %v934_v5  ;;  %v940_v12 = vshll.u32 %v1689_v17, %v934_v5  ;;  %v944_v18 = vshrl.u32 %v1691_v23, %v2474_v45  ;;  %v946_v62 = vshll.u32 %v1691_v23, %v934_v5 }
  0xe8   :  { %v870_v7 = vsel %vm868_vm10, %v869_v35, %v2495_v14  ;;  %v949_v24 = vshll.u32 %v2970_v51, %v934_v5  ;;  %v950_v39 = vshrl.u32 %v2971_v34, %v2474_v45  ;;  %v747_v11 = vadd.f32 0.008332121, %v746_v21 }
  0xe9   :  { %v871_v10 = vclz %v870_v7  ;;  %v890_v48 = vsel %vm767_vm8, %v889_v1, %v865_v0  ;;  %v943_v33 = vshll.u32 %v1690_v20, %v934_v5  ;;  %v939_v29 = vor.u32 %v938_v47, %v937_v46 }
  0xea   :  { %v942_v41 = vor.u32 %v941_v19, %v940_v12  ;;  %v948_v2 = vor.u32 %v947_v44, %v946_v62  ;;  %v951_v13 = vor.u32 %v950_v39, %v949_v24  ;;  %v741_v31 = vmul.f32 %v740_v22, %v2472_v36 }
  0xeb   :  { %v1482_v4 = vadd.s32 4294967294, %v871_v10  ;;  %v945_v43 = vor.u32 %v944_v18, %v943_v33  ;;  %v969_v16 = vand.u32 65535, %v2497_v42  ;;  %v892_v55 = vsel %vm2491_vm9, 0, %v890_v48 }
  0xec   :  { %v970_v28 = vshrl.u32 %v2497_v42, 16  ;;  %v1083_v21 = vor.u32 8388608, %v2501_v49  ;;  %v2532_v0 = vadd.s32 1, %v1487_v57  ;;  %v748_v5 = vmul.f32 %v747_v11, %v2472_v36 }
  0xed   :  { %vm1483_vm11 = vcmp.lt.s32.totalorder %v1482_v4, 0  ;;  %vm952_vm12 = vcmp.lt.s32.totalorder %v2504_v30, 1  ;;  %vm955_vm13 = vcmp.lt.s32.totalorder %v2504_v30, 4  ;;  %v742_v44 = vadd.f32 -0.4999988, %v741_v31 }
  0xee   :  { %v874_v1 = vsel %vm1483_vm11, 0, %v1482_v4  ;;  %v960_v47 = vsel %vm952_vm12, %v939_v29, %v942_v41  ;;  %v961_v35 = vsel %vm955_vm13, %v948_v2, 920167782  ;;  %v965_v19 = vsel %vm955_vm13, %v951_v13, 1326507024 }
  0xef   :  { %v875_v57 = vsub.s32 32, %v874_v1  ;;  %vm954_vm14 = vcmp.lt.s32.totalorder %v2504_v30, 3  ;;  %v964_v22 = vsel %vm952_vm12, %v942_v41, %v945_v43  ;;  %v879_v46 = vsub.s32 4294967266, %v874_v1 }
  0xf0   :  { %vm953_vm15 = vcmp.lt.s32.totalorder %v2504_v30, 2  ;;  %v962_v12 = vsel %vm954_vm14, %v945_v43, %v961_v35  ;;  %v966_v18 = vsel %vm954_vm14, %v948_v2, %v965_v19  ;;  %v749_v7 = vadd.f32 -0.16666654, %v748_v5 }
  0xf1   :  { %v876_v62 = vshll.u32 %v2495_v14, %v874_v1  ;;  %v877_v24 = vshrl.u32 %v859_v53, %v875_v57  ;;  %v963_v39 = vsel %vm953_vm15, %v960_v47, %v962_v12  ;;  %v880_v11 = vadd.s32 127, %v879_v46 }
  0xf2   :  { %v967_v10 = vsel %vm953_vm15, %v964_v22, %v966_v18  ;;  %v993_v48 = vand.u32 65535, %v963_v39  ;;  %v994_v33 = vshrl.u32 %v963_v39, 16  ;;  %v936_v13 = vshrl.u32 %v1688_v15, %v2474_v45 }
  0xf3   :  { %v957_v31 = vsel %vm955_vm13, %v945_v43, 2102212464  ;;  %v971_v2 = vand.u32 65535, %v967_v10  ;;  %v972_v4 = vshrl.u32 %v967_v10, 16  ;;  %v878_v5 = vor.u32 %v877_v24, %v876_v62 }
  0xf4   :  { %v881_v14 = vshll.u32 %v880_v11, 23  ;;  %v2560_v53 = vadd.s32 3, %v892_v55  ;;  %v996_v1 = vmul.u32 %v994_v33, %v969_v16  ;;  %v743_v47 = vmul.f32 %v742_v44, %v2472_v36 }
  0xf5   :  { %v750_v35 = vmul.f32 %v749_v7, %v2472_v36  ;;  %v956_v19 = vsel %vm952_vm12, %v936_v13, %v939_v29  ;;  %v974_v57 = vmul.u32 %v972_v4, %v969_v16  ;;  %v958_v45 = vsel %vm954_vm14, %v942_v41, %v957_v31 }
  0xf6   :  { %v882_v22 = vor.u32 4788187, %v881_v14  ;;  %v975_v43 = vmul.u32 %v971_v2, %v970_v28  ;;  %v997_v46 = vmul.u32 %v993_v48, %v970_v28  ;;  %v973_v12 = vmul.u32 %v971_v2, %v969_v16 }
  0xf7   :  { %v977_v18 = vshll.u32 %v974_v57, 16  ;;  %v995_v62 = vmul.u32 %v993_v48, %v969_v16  ;;  %v999_v55 = vshll.u32 %v996_v1, 16  ;;  %v885_v39 = vcvt.s32.f32 %v878_v5 }
  0xf8   :  { %v883_v24 = vand.u32 2147483647, %v882_v22  ;;  %v976_v11 = vmul.u32 %v972_v4, %v970_v28  ;;  %v998_v44 = vmul.u32 %v994_v33, %v970_v28  ;;  %v979_v10 = vshll.u32 %v975_v43, 16 }
  0xf9   :  { %vm981_vm0 = vc.u32 %v973_v12, %v977_v18  ;;  %v983_v36 = vadd.s32 %v977_v18, %v973_v12  ;;  %v1001_v7 = vshll.u32 %v997_v46, 16  ;;  %vm1003_vm1 = vc.u32 %v995_v62, %v999_v55 }
  0xfa   :  { %v886_v29 = vmul.f32 %v885_v39, %v883_v24  ;;  %v982_v13 = vsel %vm981_vm0, 1, %v1686_v9  ;;  %v1005_v14 = vadd.s32 %v999_v55, %v995_v62  ;;  %v959_v41 = vsel %vm953_vm15, %v956_v19, %v958_v45 }
  0xfb   :  { %v984_v31 = vadd.s32 %v982_v13, %v976_v11  ;;  %vm985_vm2 = vc.u32 %v983_v36, %v979_v10  ;;  %v1004_v16 = vsel %vm1003_vm1, 1, %v1686_v9  ;;  %v978_v33 = vshrl.u32 %v974_v57, 16 }
  0xfc   :  { %v887_v48 = vxor.u32 2147483648, %v886_v29  ;;  %v986_v2 = vsel %vm985_vm2, 1, %v1686_v9  ;;  %v1006_v28 = vadd.s32 %v1004_v16, %v998_v44  ;;  %vm1007_vm3 = vc.u32 %v1005_v14, %v1001_v7 }
  0xfd   :  { %v988_v4 = vadd.s32 %v986_v2, %v984_v31  ;;  %v1008_v5 = vsel %vm1007_vm3, 1, %v1686_v9  ;;  %vm1086_vm4 = vcmp.gt.s32.totalorder %v2532_v0, 0  ;;  %v1000_v30 = vshrl.u32 %v996_v1, 16 }
  0xfe   :  { %v888_v22 = vsel %vm767_vm8, %v887_v48, %v886_v29  ;;  %v1010_v19 = vadd.s32 %v1008_v5, %v1006_v28  ;;  %v1087_v45 = vsel %vm1086_vm4, %v2532_v0, 0  ;;  %v980_v18 = vshrl.u32 %v975_v43, 16 }
  0xff   :  { %v2581_v12 = vsel %vm2491_vm9, %v1841_v58, %v888_v22  ;;  %v989_v62 = vadd.s32 %v988_v4, %v978_v33  ;;  %v1089_v57 = vand.u32 31, %v1087_v45  ;;  %v2583_v55 = vadd.f32 1.0, %v743_v47 }
 0x100   :  { %v2587_v24 = vmul.f32 %v2581_v12, %v2581_v12  ;;  %v1002_v39 = vshrl.u32 %v997_v46, 16  ;;  %v1011_v11 = vadd.s32 %v1010_v19, %v1000_v30  ;;  %v751_v1 = vadd.f32 1.0, %v750_v35 }
 0x101   :  { %v2589_v44 = vadd.s32 %v989_v62, %v980_v18  ;;  %v2591_v0 = vadd.s32 %v1005_v14, %v1001_v7  ;;  %v1090_v10 = vsub.s32 32, %v1089_v57  ;;  %v1013_v47 = vmul.u32 %v2497_v42, %v959_v41 }
 0x102   :  { %v894_v61 = vmul.f32 -0.001358992, %v2587_v24  ;;  %v901_v43 = vmul.f32 -0.00019511016, %v2587_v24  ;;  %v1012_v36 = vadd.s32 %v1011_v11, %v1002_v39  ;;  %v2598_v29 = vshrl.u32 %v1087_v45, 5 }
 0x103   :  { %vm1015_vm5 = vc.u32 %v2589_v44, %v2591_v0  ;;  %v1092_v46 = vshll.u32 %v1688_v15, %v1089_v57  ;;  %v1093_v35 = vshrl.u32 %v1689_v17, %v1090_v10  ;;  %v1096_v31 = vshrl.u32 %v1690_v20, %v1090_v10 }
 0x104   :  { %v895_v13 = vadd.f32 0.041655596, %v894_v61  ;;  %v902_v7 = vadd.f32 0.008332121, %v901_v43  ;;  %v1016_v14 = vadd.s32 1, %v1012_v36  ;;  %v1095_v16 = vshll.u32 %v1689_v17, %v1089_v57 }
 0x105   :  { %v1099_v48 = vshrl.u32 %v1691_v23, %v1090_v10  ;;  %v1101_v42 = vshll.u32 %v1691_v23, %v1089_v57  ;;  %v1102_v41 = vshrl.u32 %v2970_v51, %v1090_v10  ;;  %v1094_v33 = vor.u32 %v1093_v35, %v1092_v46 }
 0x106   :  { %v903_v2 = vmul.f32 %v902_v7, %v2587_v24  ;;  %v1017_v28 = vsel %vm1015_vm5, %v1016_v14, %v1012_v36  ;;  %v1098_v4 = vshll.u32 %v1690_v20, %v1089_v57  ;;  %v896_v5 = vmul.f32 %v895_v13, %v2587_v24 }
 0x107   :  { %v1018_v22 = vadd.s32 %v1017_v28, %v1013_v47  ;;  %v1097_v30 = vor.u32 %v1096_v31, %v1095_v16  ;;  %v1103_v19 = vor.u32 %v1102_v41, %v1101_v42  ;;  %v1104_v62 = vshll.u32 %v2970_v51, %v1089_v57 }
 0x108   :  { %v904_v45 = vadd.f32 -0.16666654, %v903_v2  ;;  %v1100_v18 = vor.u32 %v1099_v48, %v1098_v4  ;;  %v1105_v39 = vshrl.u32 %v2971_v34, %v1090_v10  ;;  %v2613_v11 = vand.u32 3, %v2560_v53 }
 0x109   :  { %vm922_vm6 = vcmp.lt.s32.totalorder %v1844_v59, 0  ;;  %v1019_v61 = vadd.s32 536870912, %v1018_v22  ;;  %v2618_v43 = vshll.u32 %v1083_v21, 8  ;;  %v2621_v36 = vmul.f32 %v751_v1, %v2465_v25 }
 0x10a   :  { %vm760_vm7 = vcmp.eq.s32.totalorder %v2487_v56, 2  ;;  %v905_v47 = vmul.f32 %v904_v45, %v2587_v24  ;;  %v1106_v57 = vor.u32 %v1105_v39, %v1104_v62  ;;  %vm1110_vm8 = vcmp.lt.s32.totalorder %v2598_v29, 4 }
 0x10b   :  { %v1020_v46 = vshrl.u32 %v1019_v61, 30  ;;  %vm1107_vm9 = vcmp.lt.s32.totalorder %v2598_v29, 1  ;;  %vm1109_vm10 = vcmp.lt.s32.totalorder %v2598_v29, 3  ;;  %v1116_v49 = vsel %vm1110_vm8, %v1103_v19, 920167782 }
 0x10c   :  { %v761_v21 = vxor.u32 2147483648, %v2583_v55  ;;  %v897_v53 = vadd.f32 -0.4999988, %v896_v5  ;;  %vm2633_vm11 = vcmp.le.f32.partialorder %v920_v6, 0.7853982  ;;  %v1115_v1 = vsel %vm1107_vm9, %v1094_v33, %v1097_v30 }
 0x10d   :  { %v1117_v35 = vsel %vm1109_vm10, %v1100_v18, %v1116_v49  ;;  %v906_v13 = vadd.f32 1.0, %v905_v47  ;;  %v1021_v7 = vshll.u32 %v1020_v46, 30  ;;  %v1091_v14 = vshrl.u32 %v1688_v15, %v1090_v10 }
 0x10e   :  { %v1124_v31 = vand.u32 65535, %v2618_v43  ;;  %v1044_v16 = vsub.s32 4, %v1020_v46  ;;  %vm1108_vm12 = vcmp.lt.s32.totalorder %v2598_v29, 2  ;;  %v1119_v6 = vsel %vm1107_vm9, %v1097_v30, %v1100_v18 }
 0x10f   :  { %v1120_v48 = vsel %vm1110_vm8, %v1106_v57, 1326507024  ;;  %v2648_v42 = vsub.s32 %v1018_v22, %v1021_v7  ;;  %v1112_v41 = vsel %vm1110_vm8, %v1100_v18, 2102212464  ;;  %v1118_v2 = vsel %vm1108_vm12, %v1115_v1, %v1117_v35 }
 0x110   :  { %v1121_v10 = vsel %vm1109_vm10, %v1103_v19, %v1120_v48  ;;  %v898_v28 = vmul.f32 %v897_v53, %v2587_v24  ;;  %v1111_v4 = vsel %vm1107_vm9, %v1091_v14, %v1094_v33  ;;  %v1125_v22 = vshrl.u32 %v2618_v43, 16 }
 0x111   :  { %v1122_v5 = vsel %vm1108_vm12, %v1119_v6, %v1121_v10  ;;  %v2663_v45 = vmul.f32 %v906_v13, %v2581_v12  ;;  %vm1023_vm13 = vcmp.lt.s32.totalorder %v2648_v42, 0  ;;  %v1024_v18 = vsub.s32 0, %v2648_v42 }
 0x112   :  { %v1126_v62 = vand.u32 65535, %v1122_v5  ;;  %v2669_v19 = vsel %vm922_vm6, %v1044_v16, %v1020_v46  ;;  %v1113_v24 = vsel %vm1109_vm10, %v1097_v30, %v1112_v41  ;;  %v1127_v33 = vshrl.u32 %v1122_v5, 16 }
 0x113   :  { %v1148_v39 = vand.u32 65535, %v1118_v2  ;;  %v758_v61 = vxor.u32 2147483648, %v2621_v36  ;;  %v2677_v12 = vsel %vm760_vm7, %v761_v21, %v2621_v36  ;;  %v1025_v47 = vsel %vm1023_vm13, %v1024_v18, %v2648_v42 }
 0x114   :  { %v1149_v57 = vshrl.u32 %v1118_v2, 16  ;;  %v1014_v49 = vadd.s32 %v2591_v0, %v2589_v44  ;;  %v1026_v46 = vclz %v1025_v47  ;;  %v1129_v53 = vmul.u32 %v1127_v33, %v1124_v31 }
 0x115   :  { %v1130_v1 = vmul.u32 %v1126_v62, %v1125_v22  ;;  %v2682_v35 = vadd.f32 1.0, %v898_v28  ;;  %v913_v30 = vxor.u32 2147483648, %v2663_v45  ;;  %v1047_v13 = vsel %vm2633_vm11, 0, %v2669_v19 }
 0x116   :  { %v2690_v21 = vsel %vm1108_vm12, %v1111_v4, %v1113_v24  ;;  %v1485_v7 = vadd.s32 4294967294, %v1026_v46  ;;  %v1128_v14 = vmul.u32 %v1126_v62, %v1124_v31  ;;  %v1132_v16 = vshll.u32 %v1129_v53, 16 }
 0x117   :  { %v1150_v6 = vmul.u32 %v1148_v39, %v1124_v31  ;;  %v1131_v44 = vmul.u32 %v1127_v33, %v1125_v22  ;;  %v1133_v0 = vshrl.u32 %v1129_v53, 16  ;;  %v1134_v48 = vshll.u32 %v1130_v1, 16 }
 0x118   :  { %v1151_v41 = vmul.u32 %v1149_v57, %v1124_v31  ;;  %vm1486_vm14 = vcmp.lt.s32.totalorder %v1485_v7, 0  ;;  %v1135_v2 = vshrl.u32 %v1130_v1, 16  ;;  %vm1136_vm15 = vc.u32 %v1128_v14, %v1132_v16 }
 0x119   :  { %v1138_v10 = vadd.s32 %v1132_v16, %v1128_v14  ;;  %v1029_v28 = vsel %vm1486_vm14, 0, %v1485_v7  ;;  %v1137_v5 = vsel %vm1136_vm15, 1, %v1686_v9  ;;  %v1152_v18 = vmul.u32 %v1148_v39, %v1125_v22 }
 0x11a   :  { %v1154_v47 = vshll.u32 %v1151_v41, 16  ;;  %v1030_v29 = vsub.s32 32, %v1029_v28  ;;  %v1034_v4 = vsub.s32 4294967266, %v1029_v28  ;;  %v1139_v24 = vadd.s32 %v1137_v5, %v1131_v44 }
 0x11b   :  { %v1153_v46 = vmul.u32 %v1149_v57, %v1125_v22  ;;  %vm1316_vm0 = vcmp.lt.s32.totalorder %v2175_v52, 1  ;;  %v1031_v62 = vshll.u32 %v2648_v42, %v1029_v28  ;;  %vm1140_vm1 = vc.u32 %v1138_v10, %v1134_v48 }
 0x11c   :  { %vm1158_vm2 = vc.u32 %v1150_v6, %v1154_v47  ;;  %v1168_v31 = vmul.u32 %v2618_v43, %v2690_v21  ;;  %vm1319_vm3 = vcmp.lt.s32.totalorder %v2175_v52, 4  ;;  %v1032_v33 = vshrl.u32 %v1014_v49, %v1030_v29 }
 0x11d   :  { %v1035_v53 = vadd.s32 127, %v1034_v4  ;;  %v1141_v39 = vsel %vm1140_vm1, 1, %v1686_v9  ;;  %v1159_v1 = vsel %vm1158_vm2, 1, %v1686_v9  ;;  %vm1318_vm4 = vcmp.lt.s32.totalorder %v2175_v52, 3 }
 0x11e   :  { %v1143_v22 = vadd.s32 %v1141_v39, %v1139_v24  ;;  %v1156_v57 = vshll.u32 %v1152_v18, 16  ;;  %v1160_v7 = vadd.s32 %v1154_v47, %v1150_v6  ;;  %v1161_v14 = vadd.s32 %v1159_v1, %v1153_v46 }
 0x11f   :  { %v1033_v42 = vor.u32 %v1032_v33, %v1031_v62  ;;  %v1036_v16 = vshll.u32 %v1035_v53, 23  ;;  %v1155_v44 = vshrl.u32 %v1151_v41, 16  ;;  %v1301_v48 = vshll.u32 %v1688_v15, %v2169_v32 }
 0x120   :  { %vm1317_vm5 = vcmp.lt.s32.totalorder %v2175_v52, 2  ;;  %v1144_v49 = vadd.s32 %v1143_v22, %v1133_v0  ;;  %vm1162_vm7 = vc.u32 %v1160_v7, %v1156_v57  ;;  %v1300_v10 = vshrl.u32 %v1688_v15, %v2195_v38 }
 0x121   :  { %v1302_v28 = vshrl.u32 %v1689_v17, %v2195_v38  ;;  %v1037_v5 = vor.u32 4788187, %v1036_v16  ;;  %v1040_v29 = vcvt.s32.f32 %v1033_v42  ;;  %v1163_v6 = vsel %vm1162_vm7, 1, %v1686_v9 }
 0x122   :  { %v1304_v41 = vshll.u32 %v1689_v17, %v2169_v32  ;;  %v2711_v47 = vadd.s32 %v1144_v49, %v1135_v2  ;;  %v1165_v4 = vadd.s32 %v1163_v6, %v1161_v14  ;;  %v1305_v0 = vshrl.u32 %v1690_v20, %v2195_v38 }
 0x123   :  { %v1307_v24 = vshll.u32 %v1690_v20, %v2169_v32  ;;  %vm757_vm8 = vcmp.eq.s32.totalorder %v2487_v56, 0  ;;  %v1038_v15 = vand.u32 2147483647, %v1037_v5  ;;  %v1308_v46 = vshrl.u32 %v1691_v23, %v2195_v38 }
 0x124   :  { %v1310_v62 = vshll.u32 %v1691_v23, %v2169_v32  ;;  %v1311_v17 = vshrl.u32 %v2970_v51, %v2195_v38  ;;  %v1157_v2 = vshrl.u32 %v1152_v18, 16  ;;  %v2724_v33 = vadd.s32 %v1160_v7, %v1156_v57 }
 0x125   :  { %v1166_v53 = vadd.s32 %v1165_v4, %v1155_v44  ;;  %v1313_v39 = vshll.u32 %v2970_v51, %v2169_v32  ;;  %v1041_v20 = vmul.f32 %v1040_v29, %v1038_v15  ;;  %v1314_v1 = vshrl.u32 %v2971_v34, %v2195_v38 }
 0x126   :  { %v1303_v22 = vor.u32 %v1302_v28, %v1301_v48  ;;  %v1306_v14 = vor.u32 %v1305_v0, %v1304_v41  ;;  %vm912_vm9 = vcmp.eq.s32.totalorder %v2613_v11, 0  ;;  %vm1170_vm10 = vc.u32 %v2711_v47, %v2724_v33 }
 0x127   :  { %v1167_v42 = vadd.s32 %v1166_v53, %v1157_v2  ;;  %v1309_v23 = vor.u32 %v1308_v46, %v1307_v24  ;;  %v1312_v18 = vor.u32 %v1311_v17, %v1310_v62  ;;  %vm756_vm12 = vcmp.lt.s32.totalorder %v2487_v56, 2 }
 0x128   :  { %v1042_v57 = vxor.u32 2147483648, %v1041_v20  ;;  %v1315_v7 = vor.u32 %v1314_v1, %v1313_v39  ;;  %v1320_v32 = vsel %vm1316_vm0, %v1300_v10, %v1303_v22  ;;  %v1324_v38 = vsel %vm1316_vm0, %v1303_v22, %v1306_v14 }
 0x129   :  { %vm915_vm13 = vcmp.eq.s32.totalorder %v2613_v11, 2  ;;  %v1171_v51 = vadd.s32 1, %v1167_v42  ;;  %v1321_v34 = vsel %vm1319_vm3, %v1309_v23, 2102212464  ;;  %v1325_v16 = vsel %vm1319_vm3, %v1312_v18, 920167782 }
 0x12a   :  { %v1328_v44 = vsel %vm1316_vm0, %v1306_v14, %v1309_v23  ;;  %vm911_vm14 = vcmp.lt.s32.totalorder %v2613_v11, 2  ;;  %v1043_v48 = vsel %vm922_vm6, %v1042_v57, %v1041_v20  ;;  %v1329_v49 = vsel %vm1319_vm3, %v1315_v7, 1326507024 }
 0x12b   :  { %v1322_v10 = vsel %vm1318_vm4, %v1306_v14, %v1321_v34  ;;  %v1326_v28 = vsel %vm1318_vm4, %v1309_v23, %v1325_v16  ;;  %v2757_v5 = vsel %vm2633_vm11, %v1844_v59, %v1043_v48  ;;  %v1172_v29 = vsel %vm1170_vm10, %v1171_v51, %v1167_v42 }
 0x12c   :  { %v1330_v6 = vsel %vm1318_vm4, %v1312_v18, %v1329_v49  ;;  %v2766_v41 = vsel %vm1317_vm5, %v1320_v32, %v1322_v10  ;;  %v1048_v4 = vmul.f32 %v2757_v5, %v2757_v5  ;;  %v1173_v0 = vadd.s32 %v1172_v29, %v1168_v31 }
 0x12d   :  { %v1327_v24 = vsel %vm1317_vm5, %v1324_v38, %v1326_v28  ;;  %v1331_v15 = vsel %vm1317_vm5, %v1328_v44, %v1330_v6  ;;  %v759_v46 = vsel %vm757_vm8, %v2583_v55, %v758_v61  ;;  %v916_v53 = vxor.u32 2147483648, %v2682_v35 }
 0x12e   :  { %v1335_v62 = vand.u32 65535, %v1331_v15  ;;  %v1336_v17 = vshrl.u32 %v1331_v15, 16  ;;  %v1358_v2 = vshrl.u32 %v1327_v24, 16  ;;  %v1049_v39 = vmul.f32 -0.001358992, %v1048_v4 }
 0x12f   :  { %v1056_v43 = vmul.f32 -0.00019511016, %v1048_v4  ;;  %v1174_v21 = vadd.s32 536870912, %v1173_v0  ;;  %v1064_v52 = vadd.s32 3, %v1047_v13  ;;  %vm753_vm6 = vweird.f32 %v1838_v37 }
 0x130   :  { %v1337_v31 = vmul.u32 %v1335_v62, %v2178_v54  ;;  %v1338_v36 = vmul.u32 %v1336_v17, %v2178_v54  ;;  %v2790_v20 = vmul.u32 %v1335_v62, %v2190_v63  ;;  %v914_v55 = vsel %vm912_vm9, %v2682_v35, %v913_v30 }
 0x131   :  { %v1050_v61 = vadd.f32 0.041655596, %v1049_v39  ;;  %v1057_v25 = vadd.f32 0.008332121, %v1056_v43  ;;  %v2798_v1 = vshrl.u32 %v1174_v21, 30  ;;  %v763_v19 = vsel %vm756_vm12, %v759_v46, %v2677_v12 }
 0x132   :  { %v1357_v13 = vand.u32 65535, %v1327_v24  ;;  %v2804_v22 = vmul.u32 %v1358_v2, %v2178_v54  ;;  %v1341_v14 = vshll.u32 %v1338_v36, 16  ;;  %vm908_vm11 = vweird.f32 %v1841_v58 }
 0x133   :  { %v917_v42 = vsel %vm915_vm13, %v916_v53, %v2663_v45  ;;  %v1051_v35 = vmul.f32 %v1050_v61, %v1048_v4  ;;  %v1058_v30 = vmul.f32 %v1057_v25, %v1048_v4  ;;  %v1176_v23 = vshll.u32 %v2798_v1, 30 }
 0x134   :  { %v918_v18 = vsel %vm911_vm14, %v914_v55, %v917_v42  ;;  %v1340_v56 = vmul.u32 %v1336_v17, %v2190_v63  ;;  %v1343_v12 = vshll.u32 %v2790_v20, 16  ;;  %vm1345_vm15 = vc.u32 %v1337_v31, %v1341_v14 }
 0x135   :  { %v1052_v57 = vadd.f32 -0.4999988, %v1051_v35  ;;  %v1059_v7 = vadd.f32 -0.16666654, %v1058_v30  ;;  %v1065_v32 = vand.u32 3, %v1064_v52  ;;  %v1177_v38 = vsub.s32 %v1173_v0, %v1176_v23 }
 0x136   :  { %v1359_v51 = vmul.u32 %v1357_v13, %v2178_v54  ;;  %v1346_v45 = vsel %vm1345_vm15, 1, %v1686_v9  ;;  %v1347_v34 = vadd.s32 %v1341_v14, %v1337_v31  ;;  %v1363_v16 = vshll.u32 %v2804_v22, 16 }
 0x137   :  { %v1053_v44 = vmul.f32 %v1052_v57, %v1048_v4  ;;  %v1060_v48 = vmul.f32 %v1059_v7, %v1048_v4  ;;  %vm1178_vm0 = vcmp.lt.s32.totalorder %v1177_v38, 0  ;;  %v1179_v11 = vsub.s32 0, %v1177_v38 }
 0x138   :  { %v2819_v49 = vmul.u32 %v1357_v13, %v2190_v63  ;;  %v1342_v10 = vshrl.u32 %v1338_v36, 16  ;;  %v1348_v28 = vadd.s32 %v1346_v45, %v1340_v56  ;;  %vm1349_vm1 = vc.u32 %v1347_v34, %v1343_v12 }
 0x139   :  { %v1054_v29 = vadd.f32 1.0, %v1053_v44  ;;  %v1061_v6 = vadd.f32 1.0, %v1060_v48  ;;  %v1180_v0 = vsel %vm1178_vm0, %v1179_v11, %v1177_v38  ;;  %v1350_v54 = vsel %vm1349_vm1, 1, %v1686_v9 }
 0x13a   :  { %v764_v24 = vsel %vm753_vm6, nan, %v763_v19  ;;  %vm1063_vm2 = vweird.f32 %v1844_v59  ;;  %v1181_v15 = vclz %v1180_v0  ;;  %v1362_v4 = vmul.u32 %v1358_v2, %v2190_v63  ;;  %v1498_v0 = vld [vmem:[%s2943_s2 + $0x5] sm:$0x1] }
 0x13b   :  { %v1352_v46 = vadd.s32 %v1350_v54, %v1348_v28  ;;  %v1062_v62 = vmul.f32 %v1061_v6, %v2757_v5  ;;  %v1071_v17 = vxor.u32 2147483648, %v1054_v29  ;;  %v1344_v53 = vshrl.u32 %v2790_v20, 16  ;;  %v1496_v6 = vld [vmem:[%s2943_s2 + $0x4] sm:$0x1] }
 0x13c   :  { %vm1367_vm3 = vc.u32 %v1359_v51, %v1363_v16  ;;  %v919_v39 = vsel %vm908_vm11, nan, %v918_v18  ;;  %vm1066_vm4 = vcmp.lt.s32.totalorder %v1065_v32, 2  ;;  %vm1070_vm5 = vcmp.eq.s32.totalorder %v1065_v32, 2 }
 0x13d   :  { %v1488_v43 = vadd.s32 4294967294, %v1181_v15  ;;  %v1068_v37 = vxor.u32 2147483648, %v1062_v62  ;;  %v1353_v21 = vadd.s32 %v1352_v46, %v1342_v10  ;;  %v1365_v52 = vshll.u32 %v2819_v49, 16 }
 0x13e   :  { %v1368_v31 = vsel %vm1367_vm3, 1, %v1686_v9  ;;  %vm1067_vm7 = vcmp.eq.s32.totalorder %v1065_v32, 0  ;;  %v1072_v63 = vsel %vm1070_vm5, %v1071_v17, %v1062_v62  ;;  %v1369_v5 = vadd.s32 %v1363_v16, %v1359_v51  ;;  %v1500_v17 = vld [vmem:[%s2943_s2 + $0x6] sm:$0x1] }
 0x13f   :  { %vm1489_vm8 = vcmp.lt.s32.totalorder %v1488_v43, 0  ;;  %v1069_v2 = vsel %vm1067_vm7, %v1054_v29, %v1068_v37  ;;  %v2832_v20 = vadd.s32 %v1353_v21, %v1344_v53  ;;  %v1370_v55 = vadd.s32 %v1368_v31, %v1362_v4 }
 0x140   :  { %v1184_v36 = vsel %vm1489_vm8, 0, %v1488_v43  ;;  %v1073_v58 = vsel %vm1066_vm4, %v1069_v2, %v1072_v63  ;;  %v1169_v61 = vadd.s32 %v2724_v33, %v2711_v47  ;;  %v1364_v13 = vshrl.u32 %v2804_v22, 16 }
 0x141   :  { %v1185_v25 = vsub.s32 32, %v1184_v36  ;;  %v1189_v19 = vsub.s32 4294967266, %v1184_v36  ;;  %v1366_v14 = vshrl.u32 %v2819_v49, 16  ;;  %vm1371_vm9 = vc.u32 %v1369_v5, %v1365_v52  ;;  %v1490_v49 = vld [vmem:[%s2943_s2 + $0x1] sm:$0x1] }
 0x142   :  { %v1373_v42 = vadd.s32 %v1369_v5, %v1365_v52  ;;  %v1186_v35 = vshll.u32 %v1177_v38, %v1184_v36  ;;  %v1372_v18 = vsel %vm1371_vm9, 1, %v1686_v9  ;;  %v1074_v56 = vsel %vm1063_vm2, nan, %v1073_v58 }
 0x143   :  { %v1187_v30 = vshrl.u32 %v1169_v61, %v1185_v25  ;;  %v1190_v23 = vadd.s32 127, %v1189_v19  ;;  %v1374_v12 = vadd.s32 %v1372_v18, %v1370_v55  ;;  %v1230_v22 = vmul.f32 1.4142135, %v2479_v60  ;;  %v1492_v60 = vld [vmem:[%s2943_s2 + $0x2] sm:$0x1] }
 0x144   :  { %v2842_v57 = vadd.s32 %v1373_v42, %v2832_v20  ;;  %vm1379_vm10 = vc.u32 %v2832_v20, %v1373_v42  ;;  %v1231_v7 = vmul.f32 1.4142135, %v2481_v40  ;;  %v1232_v32 = vmul.f32 1.4142135, %v2484_v8  ;;  %v1494_v40 = vld [vmem:[%s2943_s2 + $0x3] sm:$0x1] }
 0x145   :  { %v1188_v47 = vor.u32 %v1187_v30, %v1186_v35  ;;  %v1191_v33 = vshll.u32 %v1190_v23, 23  ;;  %v1233_v38 = vmul.f32 1.4142135, %v764_v24  ;;  %v1234_v51 = vmul.f32 1.4142135, %v919_v39 }
 0x146   :  { %v1375_v9 = vadd.s32 %v1374_v12, %v1364_v13  ;;  %v1235_v59 = vmul.f32 1.4142135, %v1074_v56  ;;  %v1237_v34 = vpack.c.bf16 %v1230_v22, %v1230_v22  ;;  %v1238_v44 = vpack.c.bf16 %v1231_v7, %v1231_v7 }
 0x147   :  { %v1192_v45 = vor.u32 4788187, %v1191_v33  ;;  %v1195_v16 = vcvt.s32.f32 %v1188_v47  ;;  %v1239_v48 = vpack.c.bf16 %v1232_v32, %v1232_v32  ;;  %v1240_v11 = vpack.c.bf16 %v1233_v38, %v1233_v38 }
 0x148   :  { %v1241_v10 = vpack.c.bf16 %v1234_v51, %v1234_v51  ;;  %vm1245_vm12 = vcmask 1040384   ;;  %vm1246_vm13 = vsmask.f32 256  ;;  %v1242_v28 = vpack.c.bf16 %v1235_v59, %v1235_v59 }
 0x149   :  { %v1193_v8 = vand.u32 2147483647, %v1192_v45  ;;  %vm2857_vm14 = vmand %vm1245_vm12, %vm1246_vm13  ;;  %v1377_v54 = vmul.u32 %v2151_v50, %v2766_v41  ;;  %v1376_v24 = vadd.s32 %v1375_v9, %v1366_v14  ;;  %vm1077_vm6 = vcmp.lt.s32.totalorder %v1849_v26, 0 }
 0x14a   :  { %v1249_v4 = vsel %vm2857_vm14, %v1237_v34, %v1490_v49  ;;  %v1252_v46 = vsel %vm2857_vm14, %v1238_v44, %v1492_v60  ;;  %v1255_v62 = vsel %vm2857_vm14, %v1239_v48, %v1494_v40  ;;  %v1258_v50 = vsel %vm2857_vm14, %v1240_v11, %v1496_v6 }
 0x14b   :  { %v1196_v15 = vmul.f32 %v1195_v16, %v1193_v8  ;;  %1491 = vst [vmem:[%s2943_s2 + $0x1] sm:$0x1] %v1249_v4  ;;  %v1380_v41 = vadd.s32 1, %v1376_v24  ;;  %v1261_v39 = vsel %vm2857_vm14, %v1241_v10, %v1498_v0  ;;  %v1199_v43 = vsub.s32 4, %v2798_v1  ;;  %v1502_v0 = vld [vmem:[%s2943_s2 + $0x7] sm:$0x1] }
 0x14c   :  { %1493 = vst [vmem:[%s2943_s2 + $0x2] sm:$0x1] %v1252_v46  ;;  %v1264_v37 = vsel %vm2857_vm14, %v1242_v28, %v1500_v17  ;;  %vm2899_vm11 = vcmp.le.f32.partialorder %v1075_v27, 0.7853982  ;;  %vm1218_vm4 = vweird.f32 %v1849_v26  ;;  %vm1286_vm5 = vcmp.lt.s32.totalorder %v1723_v3, 0 }
 0x14d   :  { %v1197_v53 = vxor.u32 2147483648, %v1196_v15  ;;  %1495 = vst [vmem:[%s2943_s2 + $0x3] sm:$0x1] %v1255_v62  ;;  %v1381_v21 = vsel %vm1379_vm10, %v1380_v41, %v1376_v24  ;;  %v1200_v36 = vsel %vm1077_vm6, %v1199_v43, %v2798_v1  ;;  %v2986_v62 = vand.u32 2147483647, %v1723_v3 }
 0x14e   :  { %1497 = vst [vmem:[%s2943_s2 + $0x4] sm:$0x1] %v1258_v50  ;;  %v1382_v63 = vadd.s32 %v1381_v21, %v1377_v54  ;;  %v1202_v61 = vsel %vm2899_vm11, 0, %v1200_v36  ;;  %vm1427_vm12 = vweird.f32 %v1723_v3 }
 0x14f   :  { %v1198_v31 = vsel %vm1077_vm6, %v1197_v53, %v1196_v15  ;;  %1499 = vst [vmem:[%s2943_s2 + $0x5] sm:$0x1] %v1261_v39  ;;  %v1219_v30 = vadd.s32 3, %v1202_v61  ;;  %vm1285_vm7 = vcmp.le.f32.partialorder %v2986_v62, 0.7853982 }
 0x150   :  { %v1201_v5 = vsel %vm2899_vm11, %v1849_v26, %v1198_v31  ;;  %1501 = vst [vmem:[%s2943_s2 + $0x6] sm:$0x1] %v1264_v37  ;;  %v1383_v27 = vadd.s32 536870912, %v1382_v63 }
 0x151   :  { %v1203_v2 = vmul.f32 %v1201_v5, %v1201_v5  ;;  %v1220_v32 = vand.u32 3, %v1219_v30 }
 0x152   :  { %v1384_v58 = vshrl.u32 %v1383_v27, 30 }
 0x153   :  { %v1204_v20 = vmul.f32 -0.001358992, %v1203_v2  ;;  %v1211_v55 = vmul.f32 -0.00019511016, %v1203_v2  ;;  %vm1222_vm1 = vcmp.eq.s32.totalorder %v1220_v32, 0  ;;  %vm1225_vm2 = vcmp.eq.s32.totalorder %v1220_v32, 2 }
 0x154   :  { %v1385_v13 = vshll.u32 %v1384_v58, 30  ;;  %vm1221_vm3 = vcmp.lt.s32.totalorder %v1220_v32, 2 }
 0x155   :  { %v1205_v25 = vadd.f32 0.041655596, %v1204_v20  ;;  %v1212_v19 = vadd.f32 0.008332121, %v1211_v55 }
 0x156   :  { %v1386_v35 = vsub.s32 %v1382_v63, %v1385_v13 }
 0x157   :  { %v1206_v14 = vmul.f32 %v1205_v25, %v1203_v2  ;;  %v1213_v42 = vmul.f32 %v1212_v19, %v1203_v2 }
 0x158   :  { %vm1387_vm15 = vcmp.lt.s32.totalorder %v1386_v35, 0  ;;  %v1388_v56 = vsub.s32 0, %v1386_v35 }
 0x159   :  { %v1207_v23 = vadd.f32 -0.4999988, %v1206_v14  ;;  %v1214_v18 = vadd.f32 -0.16666654, %v1213_v42 }
 0x15a   :  { %v1389_v1 = vsel %vm1387_vm15, %v1388_v56, %v1386_v35  ;;  %v1441_v56 = vld [vmem:[%s2943_s2] sm:$0x1] }
 0x15b   :  { %v1208_v12 = vmul.f32 %v1207_v23, %v1203_v2  ;;  %v1215_v47 = vmul.f32 %v1214_v18, %v1203_v2  ;;  %v1390_v33 = vclz %v1389_v1 }
 0x15d   :  { %v1209_v22 = vadd.f32 1.0, %v1208_v12  ;;  %v1216_v7 = vadd.f32 1.0, %v1215_v47  ;;  %v1505_v38 = vadd.s32 4294967294, %v1390_v33 }
 0x15f   :  { %v1217_v51 = vmul.f32 %v1216_v7, %v1201_v5  ;;  %v1226_v9 = vxor.u32 2147483648, %v1209_v22  ;;  %vm1506_vm0 = vcmp.lt.s32.totalorder %v1505_v38, 0 }
 0x160   :  { %v1393_v59 = vsel %vm1506_vm0, 0, %v1505_v38 }
 0x161   :  { %v1223_v45 = vxor.u32 2147483648, %v1217_v51  ;;  %v1394_v34 = vsub.s32 32, %v1393_v59  ;;  %v1395_v16 = vshll.u32 %v1386_v35, %v1393_v59  ;;  %v1398_v44 = vsub.s32 4294967266, %v1393_v59 }
 0x162   :  { %v1227_v11 = vsel %vm1225_vm2, %v1226_v9, %v1217_v51 }
 0x163   :  { %v1224_v48 = vsel %vm1222_vm1, %v1209_v22, %v1223_v45  ;;  %v1396_v60 = vshrl.u32 %v2842_v57, %v1394_v34  ;;  %v1399_v40 = vadd.s32 127, %v1398_v44  ;;  %v1408_v57 = vsub.s32 4, %v1384_v58 }
 0x164   :  { %v1228_v49 = vsel %vm1221_vm3, %v1224_v48, %v1227_v11 }
 0x165   :  { %v1229_v8 = vsel %vm1218_vm4, nan, %v1228_v49  ;;  %v1397_v28 = vor.u32 %v1396_v60, %v1395_v16  ;;  %v1400_v6 = vshll.u32 %v1399_v40, 23  ;;  %v1409_v41 = vsel %vm1286_vm5, %v1408_v57, %v1384_v58 }
 0x166   :  { %v1236_v10 = vmul.f32 1.4142135, %v1229_v8  ;;  %v1411_v43 = vsel %vm1285_vm7, 0, %v1409_v41 }
 0x167   :  { %v1401_v24 = vor.u32 4788187, %v1400_v6  ;;  %v1404_v15 = vcvt.s32.f32 %v1397_v28  ;;  %v1428_v63 = vadd.s32 3, %v1411_v43 }
 0x168   :  { %v1243_v54 = vpack.c.bf16 %v1236_v10, %v1236_v10 }
 0x169   :  { %v1402_v46 = vand.u32 2147483647, %v1401_v24  ;;  %v1429_v20 = vand.u32 3, %v1428_v63 }
 0x16a   :  { %v1267_v4 = vsel %vm2857_vm14, %v1243_v54, %v1502_v0 }
 0x16b   :  { %1503 = vst [vmem:[%s2943_s2 + $0x7] sm:$0x1] %v1267_v4  ;;  %v1405_v26 = vmul.f32 %v1404_v15, %v1402_v46  ;;  %vm1434_vm8 = vcmp.eq.s32.totalorder %v1429_v20, 2  ;;  %vm1431_vm9 = vcmp.eq.s32.totalorder %v1429_v20, 0  ;;  %vm1430_vm10 = vcmp.lt.s32.totalorder %v1429_v20, 2 }
 0x16d   :  { %v1406_v17 = vxor.u32 2147483648, %v1405_v26 }
 0x16f   :  { %v1407_v50 = vsel %vm1286_vm5, %v1406_v17, %v1405_v26 }
 0x170   :  { %v1410_v53 = vsel %vm1285_vm7, %v1723_v3, %v1407_v50 }
 0x171   :  { %v1412_v39 = vmul.f32 %v1410_v53, %v1410_v53 }
 0x173   :  { %v1413_v37 = vmul.f32 -0.001358992, %v1412_v39  ;;  %v1420_v21 = vmul.f32 -0.00019511016, %v1412_v39 }
 0x175   :  { %v1414_v52 = vadd.f32 0.041655596, %v1413_v37  ;;  %v1421_v31 = vadd.f32 0.008332121, %v1420_v21 }
 0x177   :  { %v1415_v5 = vmul.f32 %v1414_v52, %v1412_v39  ;;  %v1422_v2 = vmul.f32 %v1421_v31, %v1412_v39 }
 0x179   :  { %v1416_v27 = vadd.f32 -0.4999988, %v1415_v5  ;;  %v1423_v36 = vadd.f32 -0.16666654, %v1422_v2 }
 0x17b   :  { %v1417_v55 = vmul.f32 %v1416_v27, %v1412_v39  ;;  %v1424_v61 = vmul.f32 %v1423_v36, %v1412_v39 }
 0x17d   :  { %v1418_v25 = vadd.f32 1.0, %v1417_v55  ;;  %v1425_v19 = vadd.f32 1.0, %v1424_v61 }
 0x17f   :  { %v1426_v58 = vmul.f32 %v1425_v19, %v1410_v53  ;;  %v1435_v13 = vxor.u32 2147483648, %v1418_v25 }
 0x181   :  { %v1432_v14 = vxor.u32 2147483648, %v1426_v58  ;;  %v1436_v42 = vsel %vm1434_vm8, %v1435_v13, %v1426_v58 }
 0x183   :  { %v1433_v35 = vsel %vm1431_vm9, %v1418_v25, %v1432_v14 }
 0x184   :  { %v1437_v30 = vsel %vm1430_vm10, %v1433_v35, %v1436_v42 }
 0x185   :  { %v1438_v23 = vsel %vm1427_vm12, nan, %v1437_v30 }
 0x186   :  { %v1439_v18 = vmul.f32 1.4142135, %v1438_v23 }
 0x188   :  { %v1440_v12 = vpack.c.bf16 %v1439_v18, %v1439_v18 }
 0x18a   :  { %v1442_v47 = vsel %vm2857_vm14, %v1440_v12, %v1441_v56 }
 0x18b   :  { %1443 = vst [vmem:[%s2943_s2] sm:$0x1] %v1442_v47 }
 0x18c   :  { %1677 = dma.done.wait [#allocation4], 128  }
 0x18d   :  { %1678 = vsyncadd [#allocation4], 4294967168 }
 0x18e   :  { %1466 = vsyncpa [#allocation3], 1 }
 0x18f   :  { %1467 = vsyncpa [#allocation6], 1 }
 0x190   :  { %1468 = vsyncpa [#allocation4], 1 }

</bundles_post_ra>
